<compile_context>
chip_gen: v7x
topology: tpu7x:2x2x1
jax: 0.10.0
libtpu: 0.0.40
codegen_flags: <defaults>
</compile_context>

<pallas_src>
import functools

import jax
import jax.numpy as jnp
import numpy as np
from jax.experimental import pallas as pl
from jax.experimental.pallas import tpu as pltpu

INPUT_SIZE = 3
HIDDEN = 64
NUM_LAYERS = 2          # hard-coded as two explicit cells below
OUTPUT_LEN = 10
IN_PAD = 8              # pad input feature dim (3 -> 8) for layout friendliness
BATCH_PAD = 8           # pad batch to one f32 sublane tile
OUT_PAD = 128           # lane-dense output width (true outputs in lanes [0, 10))


def seq2seq_lstm_kernel(x_ref,       # (T*Bp, IN_PAD)  time-major, batch+feature padded
                        w_ih0_ref,   # (IN_PAD, 4H)    gate cols [i,f,o,g]
                        b0_ref,      # (1, 4H)         b_ih_l0 + b_hh_l0, permuted
                        w_hh0_ref,   # (H, 4H)
                        w_hh1_ref,   # (H, 4H)
                        w_ih1_ref,   # (H, 4H)
                        b1_ref,      # (1, 4H)         b_ih_l1 + b_hh_l1, permuted
                        fc_w_ref,    # (H, OUT_PAD)
                        fc_b_ref,    # (1, OUT_PAD)
                        out_ref,     # (Bp, OUT_PAD)
                        *, seq_len, batch_pad, hidden):
    Bp = batch_pad
    H = hidden

    # ---- hoisted layer-0 input projection: one matmul for all T steps (b0 folded) ----
    x_proj = (jnp.dot(x_ref[...], w_ih0_ref[...],
                      preferred_element_type=jnp.float32) + b0_ref[...])   # (T*Bp, 4H)

    b1 = b1_ref[...]   # (1, 4H), broadcasts along sublanes for free on the VPU

    # zero-initialized hidden/cell state (PyTorch default when (h0, c0) omitted)
    h0 = jnp.zeros((Bp, H), jnp.float32)
    c0 = jnp.zeros((Bp, H), jnp.float32)
    h1 = jnp.zeros((Bp, H), jnp.float32)
    c1 = jnp.zeros((Bp, H), jnp.float32)

    def gates_to_hc(gates, c_prev):
        # gate column order is [i, f, o, g] (permuted wrapper-side):
        # sigmoid only over the i/f/o lanes, tanh only over the g lanes.
        sig = jax.nn.sigmoid(gates[:, :3 * H])
        g = jnp.tanh(gates[:, 3 * H:])
        i = sig[:, 0 * H:1 * H]
        f = sig[:, 1 * H:2 * H]
        o = sig[:, 2 * H:3 * H]
        c_new = f * c_prev + i * g
        h_new = o * jnp.tanh(c_new)
        return h_new, c_new

    # T is static and small -> fully unroll; all slices below are static and
    # sublane-aligned (Bp == 8).
    for t in range(seq_len):
        # two INDEPENDENT recurrent dots; the MXU pipelines them back-to-back.
        hg0 = jnp.dot(h0, w_hh0_ref[...], preferred_element_type=jnp.float32)
        hg1 = jnp.dot(h1, w_hh1_ref[...], preferred_element_type=jnp.float32)

        # layer 0: input projection already hoisted, only the recurrent add remains
        gates0 = x_proj[t * Bp:(t + 1) * Bp, :] + hg0
        h0, c0 = gates_to_hc(gates0, c0)

        # layer 1: only h0(t) @ w_ih1 is serialized within the step
        gates1 = (jnp.dot(h0, w_ih1_ref[...], preferred_element_type=jnp.float32)
                  + hg1 + b1)
        h1, c1 = gates_to_hc(gates1, c1)

    # fc(last_hidden) where last_hidden == out[:, -1, :] == top-layer h at t = T-1
    # Lane-dense (Bp, 128) store; wrapper slices the real (B, 10) block out.
    out_ref[...] = (jnp.dot(h1, fc_w_ref[...], preferred_element_type=jnp.float32)
                    + fc_b_ref[...])


def init_params(key, input_size=INPUT_SIZE, hidden=HIDDEN, output_len=OUTPUT_LEN):
    """Deterministic synthetic parameters (PyTorch-like uniform(-1/sqrt(H), 1/sqrt(H)))."""
    ks = jax.random.split(key, 12)
    s = 1.0 / np.sqrt(hidden)
    u = lambda k, shape: jax.random.uniform(k, shape, jnp.float32, -s, s)
    p = {
        # layer 0 (input_size -> hidden), PyTorch shapes, gate order [i,f,g,o]
        "w_ih_l0": u(ks[0], (4 * hidden, input_size)),
        "w_hh_l0": u(ks[1], (4 * hidden, hidden)),
        "b_ih_l0": u(ks[2], (4 * hidden,)),
        "b_hh_l0": u(ks[3], (4 * hidden,)),
        # layer 1 (hidden -> hidden)
        "w_ih_l1": u(ks[4], (4 * hidden, hidden)),
        "w_hh_l1": u(ks[5], (4 * hidden, hidden)),
        "b_ih_l1": u(ks[6], (4 * hidden,)),
        "b_hh_l1": u(ks[7], (4 * hidden,)),
        # fc: Linear(hidden, output_len)
        "fc_w": u(ks[8], (output_len, hidden)),
        "fc_b": u(ks[9], (output_len,)),
    }
    return p


def prepare_params(params, input_size=INPUT_SIZE, hidden=HIDDEN,
                   output_len=OUTPUT_LEN):
    """One-time weight-layout prep (transpose, gate permute [i,f,g,o]->[i,f,o,g],
    zero-pad, bias folding). Keep this OUT of the per-call forward path."""
    H = hidden
    G = 4 * H

    def permute_cols(w_t):   # (in, 4H) cols [i,f,g,o] -> [i,f,o,g]
        return jnp.concatenate([w_t[:, :2 * H], w_t[:, 3 * H:], w_t[:, 2 * H:3 * H]],
                               axis=1)

    def permute_bias(b):     # (4H,) [i,f,g,o] -> [i,f,o,g]
        return jnp.concatenate([b[:2 * H], b[3 * H:], b[2 * H:3 * H]])

    w_ih0_t = permute_cols(params["w_ih_l0"].T)                     # (F, 4H)
    w_ih0 = jnp.zeros((IN_PAD, G), jnp.float32).at[:input_size, :].set(w_ih0_t)
    b0 = permute_bias(params["b_ih_l0"] + params["b_hh_l0"]).reshape(1, G)

    w_hh0 = permute_cols(params["w_hh_l0"].T)                       # (H, 4H)
    w_hh1 = permute_cols(params["w_hh_l1"].T)                       # (H, 4H)
    w_ih1 = permute_cols(params["w_ih_l1"].T)                       # (H, 4H)
    b1 = permute_bias(params["b_ih_l1"] + params["b_hh_l1"]).reshape(1, G)

    fc_w = jnp.zeros((H, OUT_PAD), jnp.float32).at[:, :output_len].set(params["fc_w"].T)
    fc_b = jnp.zeros((1, OUT_PAD), jnp.float32).at[:, :output_len].set(
        params["fc_b"].reshape(1, output_len))

    return {"w_ih0": w_ih0, "b0": b0, "w_hh0": w_hh0, "w_hh1": w_hh1,
            "w_ih1": w_ih1, "b1": b1, "fc_w": fc_w, "fc_b": fc_b}


def seq2seq_lstm_forward(x, prep):
    """x: (B, T, INPUT_SIZE) float32  ->  (B, OUTPUT_LEN) float32."""
    B, T, F = x.shape
    Bp = BATCH_PAD

    # time-major, batch padded to one sublane tile, features padded to IN_PAD:
    # row t*Bp + b  ==  x[b, t, :]   (rows b >= B are zero and discarded)
    x_tm = jnp.transpose(x, (1, 0, 2))                                 # (T, B, F)
    x_pad = jnp.zeros((T, Bp, IN_PAD), jnp.float32).at[:, :B, :F].set(x_tm)
    x2d = x_pad.reshape(T * Bp, IN_PAD)

    # NOTE: at production batch sizes, add a leading grid axis over batch tiles
    # (multiples of 8 rows) with dimension_semantics=("parallel",) to use both
    # v7x TensorCores, and chunk the hoisted x_proj over T via an "arbitrary"
    # grid axis if T*Bp*4H*4B threatens v7x's 64 MiB VMEM. Moot at B=2, T=8.
    vmem = pl.BlockSpec(memory_space=pltpu.MemorySpace.VMEM)
    out = pl.pallas_call(
        functools.partial(seq2seq_lstm_kernel, seq_len=T, batch_pad=Bp,
                          hidden=HIDDEN),
        out_shape=jax.ShapeDtypeStruct((Bp, OUT_PAD), jnp.float32),
        in_specs=[vmem] * 9,
        out_specs=vmem,
    )(x2d, prep["w_ih0"], prep["b0"], prep["w_hh0"], prep["w_hh1"],
      prep["w_ih1"], prep["b1"], prep["fc_w"], prep["fc_b"])
    return out[:B, :OUTPUT_LEN]


def reference_forward(x, params):
    """Pure-JAX reference replicating PyTorch nn.LSTM + nn.Linear semantics."""
    B, T, _ = x.shape
    H = HIDDEN

    def cell(x_t, h, c, w_ih, w_hh, b_ih, b_hh):
        gates = x_t @ w_ih.T + b_ih + h @ w_hh.T + b_hh
        i = jax.nn.sigmoid(gates[:, 0 * H:1 * H])
        f = jax.nn.sigmoid(gates[:, 1 * H:2 * H])
        g = jnp.tanh(gates[:, 2 * H:3 * H])
        o = jax.nn.sigmoid(gates[:, 3 * H:4 * H])
        c = f * c + i * g
        h = o * jnp.tanh(c)
        return h, c

    h0 = c0 = h1 = c1 = jnp.zeros((B, H), jnp.float32)
    for t in range(T):
        h0, c0 = cell(x[:, t, :], h0, c0, params["w_ih_l0"], params["w_hh_l0"],
                      params["b_ih_l0"], params["b_hh_l0"])
        h1, c1 = cell(h0, h1, c1, params["w_ih_l1"], params["w_hh_l1"],
                      params["b_ih_l1"], params["b_hh_l1"])
    return h1 @ params["fc_w"].T + params["fc_b"]


if __name__ == "__main__":
    key = jax.random.PRNGKey(0)
    k_param, k_x = jax.random.split(key)

    B, T = 2, 8
    params = init_params(k_param)
    prep = prepare_params(params)          # one-time layout prep (not per forward)
    x = jax.random.normal(k_x, (B, T, INPUT_SIZE), jnp.float32)

    out = seq2seq_lstm_forward(x, prep)
    out = jax.block_until_ready(out)

    ref = reference_forward(x, params)
    np.testing.assert_allclose(np.asarray(out), np.asarray(ref), rtol=1e-5, atol=1e-5)

    assert out.shape == (B, OUTPUT_LEN)
    print("KERNEL_OK")
</pallas_src>

<mosaic_0001>
module attributes {stable_mosaic.version = 11 : i64} {
  func.func @seq2seq_lstm_kernel(%arg0: memref<64x8xf32, #tpu.memory_space<vmem>>, %arg1: memref<8x256xf32, #tpu.memory_space<vmem>>, %arg2: memref<1x256xf32, #tpu.memory_space<vmem>>, %arg3: memref<64x256xf32, #tpu.memory_space<vmem>>, %arg4: memref<64x256xf32, #tpu.memory_space<vmem>>, %arg5: memref<64x256xf32, #tpu.memory_space<vmem>>, %arg6: memref<1x256xf32, #tpu.memory_space<vmem>>, %arg7: memref<64x128xf32, #tpu.memory_space<vmem>>, %arg8: memref<1x128xf32, #tpu.memory_space<vmem>>, %arg9: memref<8x128xf32, #tpu.memory_space<vmem>>) attributes {dimension_semantics = [], scalar_prefetch = 0 : i64, scratch_operands = 0 : i64, tpu.core_type = #tpu.core_type<tc>} {
    %c0 = arith.constant 0 : index
    %c0_0 = arith.constant 0 : index
    %0 = vector.load %arg0[%c0, %c0_0] : memref<64x8xf32, #tpu.memory_space<vmem>>, vector<64x8xf32>
    %c0_1 = arith.constant 0 : index
    %c0_2 = arith.constant 0 : index
    %1 = vector.load %arg1[%c0_1, %c0_2] : memref<8x256xf32, #tpu.memory_space<vmem>>, vector<8x256xf32>
    %cst = arith.constant dense<0.000000e+00> : vector<64x256xf32>
    %2 = tpu.matmul %0, %1, %cst {dimension_numbers = #tpu.dot_dimension_numbers<[1], [0], [0], [1], [0, 0, 1, 1], [], []>} : vector<64x8xf32>, vector<8x256xf32>, vector<64x256xf32> -> vector<64x256xf32>
    %c0_3 = arith.constant 0 : index
    %c0_4 = arith.constant 0 : index
    %3 = vector.load %arg2[%c0_3, %c0_4] : memref<1x256xf32, #tpu.memory_space<vmem>>, vector<1x256xf32>
    %4 = vector.broadcast %3 : vector<1x256xf32> to vector<64x256xf32>
    %5 = arith.addf %2, %4 : vector<64x256xf32>
    %c0_5 = arith.constant 0 : index
    %c0_6 = arith.constant 0 : index
    %6 = vector.load %arg6[%c0_5, %c0_6] : memref<1x256xf32, #tpu.memory_space<vmem>>, vector<1x256xf32>
    %cst_7 = arith.constant 0.000000e+00 : f32
    %7 = vector.broadcast %cst_7 : f32 to vector<8x64xf32>
    %cst_8 = arith.constant 0.000000e+00 : f32
    %8 = vector.broadcast %cst_8 : f32 to vector<8x64xf32>
    %cst_9 = arith.constant 0.000000e+00 : f32
    %9 = vector.broadcast %cst_9 : f32 to vector<8x64xf32>
    %cst_10 = arith.constant 0.000000e+00 : f32
    %10 = vector.broadcast %cst_10 : f32 to vector<8x64xf32>
    %c0_11 = arith.constant 0 : index
    %c0_12 = arith.constant 0 : index
    %11 = vector.load %arg3[%c0_11, %c0_12] : memref<64x256xf32, #tpu.memory_space<vmem>>, vector<64x256xf32>
    %cst_13 = arith.constant dense<0.000000e+00> : vector<8x256xf32>
    %12 = tpu.matmul %7, %11, %cst_13 {dimension_numbers = #tpu.dot_dimension_numbers<[1], [0], [0], [1], [0, 0, 1, 1], [], []>} : vector<8x64xf32>, vector<64x256xf32>, vector<8x256xf32> -> vector<8x256xf32>
    %c0_14 = arith.constant 0 : index
    %c0_15 = arith.constant 0 : index
    %13 = vector.load %arg4[%c0_14, %c0_15] : memref<64x256xf32, #tpu.memory_space<vmem>>, vector<64x256xf32>
    %cst_16 = arith.constant dense<0.000000e+00> : vector<8x256xf32>
    %14 = tpu.matmul %9, %13, %cst_16 {dimension_numbers = #tpu.dot_dimension_numbers<[1], [0], [0], [1], [0, 0, 1, 1], [], []>} : vector<8x64xf32>, vector<64x256xf32>, vector<8x256xf32> -> vector<8x256xf32>
    %15 = vector.extract_strided_slice %5 {offsets = [0, 0], sizes = [8, 256], strides = [1, 1]} : vector<64x256xf32> to vector<8x256xf32>
    %16 = arith.addf %15, %12 : vector<8x256xf32>
    %17 = vector.extract_strided_slice %16 {offsets = [0, 0], sizes = [8, 192], strides = [1, 1]} : vector<8x256xf32> to vector<8x192xf32>
    %18 = arith.negf %17 : vector<8x192xf32>
    %19 = math.exp %18 : vector<8x192xf32>
    %cst_17 = arith.constant 1.000000e+00 : f32
    %20 = vector.broadcast %cst_17 : f32 to vector<8x192xf32>
    %21 = arith.addf %20, %19 : vector<8x192xf32>
    %22 = arith.divf %20, %21 : vector<8x192xf32>
    %23 = vector.extract_strided_slice %16 {offsets = [0, 192], sizes = [8, 64], strides = [1, 1]} : vector<8x256xf32> to vector<8x64xf32>
    %24 = math.tanh %23 : vector<8x64xf32>
    %25 = vector.extract_strided_slice %22 {offsets = [0, 0], sizes = [8, 64], strides = [1, 1]} : vector<8x192xf32> to vector<8x64xf32>
    %26 = vector.extract_strided_slice %22 {offsets = [0, 64], sizes = [8, 64], strides = [1, 1]} : vector<8x192xf32> to vector<8x64xf32>
    %27 = vector.extract_strided_slice %22 {offsets = [0, 128], sizes = [8, 64], strides = [1, 1]} : vector<8x192xf32> to vector<8x64xf32>
    %28 = arith.mulf %26, %8 : vector<8x64xf32>
    %29 = arith.mulf %25, %24 : vector<8x64xf32>
    %30 = arith.addf %28, %29 : vector<8x64xf32>
    %31 = math.tanh %30 : vector<8x64xf32>
    %32 = arith.mulf %27, %31 : vector<8x64xf32>
    %c0_18 = arith.constant 0 : index
    %c0_19 = arith.constant 0 : index
    %33 = vector.load %arg5[%c0_18, %c0_19] : memref<64x256xf32, #tpu.memory_space<vmem>>, vector<64x256xf32>
    %cst_20 = arith.constant dense<0.000000e+00> : vector<8x256xf32>
    %34 = tpu.matmul %32, %33, %cst_20 {dimension_numbers = #tpu.dot_dimension_numbers<[1], [0], [0], [1], [0, 0, 1, 1], [], []>} : vector<8x64xf32>, vector<64x256xf32>, vector<8x256xf32> -> vector<8x256xf32>
    %35 = arith.addf %34, %14 : vector<8x256xf32>
    %36 = vector.broadcast %6 : vector<1x256xf32> to vector<8x256xf32>
    %37 = arith.addf %35, %36 : vector<8x256xf32>
    %38 = vector.extract_strided_slice %37 {offsets = [0, 0], sizes = [8, 192], strides = [1, 1]} : vector<8x256xf32> to vector<8x192xf32>
    %39 = arith.negf %38 : vector<8x192xf32>
    %40 = math.exp %39 : vector<8x192xf32>
    %cst_21 = arith.constant 1.000000e+00 : f32
    %41 = vector.broadcast %cst_21 : f32 to vector<8x192xf32>
    %42 = arith.addf %41, %40 : vector<8x192xf32>
    %43 = arith.divf %41, %42 : vector<8x192xf32>
    %44 = vector.extract_strided_slice %37 {offsets = [0, 192], sizes = [8, 64], strides = [1, 1]} : vector<8x256xf32> to vector<8x64xf32>
    %45 = math.tanh %44 : vector<8x64xf32>
    %46 = vector.extract_strided_slice %43 {offsets = [0, 0], sizes = [8, 64], strides = [1, 1]} : vector<8x192xf32> to vector<8x64xf32>
    %47 = vector.extract_strided_slice %43 {offsets = [0, 64], sizes = [8, 64], strides = [1, 1]} : vector<8x192xf32> to vector<8x64xf32>
    %48 = vector.extract_strided_slice %43 {offsets = [0, 128], sizes = [8, 64], strides = [1, 1]} : vector<8x192xf32> to vector<8x64xf32>
    %49 = arith.mulf %47, %10 : vector<8x64xf32>
    %50 = arith.mulf %46, %45 : vector<8x64xf32>
    %51 = arith.addf %49, %50 : vector<8x64xf32>
    %52 = math.tanh %51 : vector<8x64xf32>
    %53 = arith.mulf %48, %52 : vector<8x64xf32>
    %c0_22 = arith.constant 0 : index
    %c0_23 = arith.constant 0 : index
    %54 = vector.load %arg3[%c0_22, %c0_23] : memref<64x256xf32, #tpu.memory_space<vmem>>, vector<64x256xf32>
    %cst_24 = arith.constant dense<0.000000e+00> : vector<8x256xf32>
    %55 = tpu.matmul %32, %54, %cst_24 {dimension_numbers = #tpu.dot_dimension_numbers<[1], [0], [0], [1], [0, 0, 1, 1], [], []>} : vector<8x64xf32>, vector<64x256xf32>, vector<8x256xf32> -> vector<8x256xf32>
    %c0_25 = arith.constant 0 : index
    %c0_26 = arith.constant 0 : index
    %56 = vector.load %arg4[%c0_25, %c0_26] : memref<64x256xf32, #tpu.memory_space<vmem>>, vector<64x256xf32>
    %cst_27 = arith.constant dense<0.000000e+00> : vector<8x256xf32>
    %57 = tpu.matmul %53, %56, %cst_27 {dimension_numbers = #tpu.dot_dimension_numbers<[1], [0], [0], [1], [0, 0, 1, 1], [], []>} : vector<8x64xf32>, vector<64x256xf32>, vector<8x256xf32> -> vector<8x256xf32>
    %58 = vector.extract_strided_slice %5 {offsets = [8, 0], sizes = [8, 256], strides = [1, 1]} : vector<64x256xf32> to vector<8x256xf32>
    %59 = arith.addf %58, %55 : vector<8x256xf32>
    %60 = vector.extract_strided_slice %59 {offsets = [0, 0], sizes = [8, 192], strides = [1, 1]} : vector<8x256xf32> to vector<8x192xf32>
    %61 = arith.negf %60 : vector<8x192xf32>
    %62 = math.exp %61 : vector<8x192xf32>
    %cst_28 = arith.constant 1.000000e+00 : f32
    %63 = vector.broadcast %cst_28 : f32 to vector<8x192xf32>
    %64 = arith.addf %63, %62 : vector<8x192xf32>
    %65 = arith.divf %63, %64 : vector<8x192xf32>
    %66 = vector.extract_strided_slice %59 {offsets = [0, 192], sizes = [8, 64], strides = [1, 1]} : vector<8x256xf32> to vector<8x64xf32>
    %67 = math.tanh %66 : vector<8x64xf32>
    %68 = vector.extract_strided_slice %65 {offsets = [0, 0], sizes = [8, 64], strides = [1, 1]} : vector<8x192xf32> to vector<8x64xf32>
    %69 = vector.extract_strided_slice %65 {offsets = [0, 64], sizes = [8, 64], strides = [1, 1]} : vector<8x192xf32> to vector<8x64xf32>
    %70 = vector.extract_strided_slice %65 {offsets = [0, 128], sizes = [8, 64], strides = [1, 1]} : vector<8x192xf32> to vector<8x64xf32>
    %71 = arith.mulf %69, %30 : vector<8x64xf32>
    %72 = arith.mulf %68, %67 : vector<8x64xf32>
    %73 = arith.addf %71, %72 : vector<8x64xf32>
    %74 = math.tanh %73 : vector<8x64xf32>
    %75 = arith.mulf %70, %74 : vector<8x64xf32>
    %c0_29 = arith.constant 0 : index
    %c0_30 = arith.constant 0 : index
    %76 = vector.load %arg5[%c0_29, %c0_30] : memref<64x256xf32, #tpu.memory_space<vmem>>, vector<64x256xf32>
    %cst_31 = arith.constant dense<0.000000e+00> : vector<8x256xf32>
    %77 = tpu.matmul %75, %76, %cst_31 {dimension_numbers = #tpu.dot_dimension_numbers<[1], [0], [0], [1], [0, 0, 1, 1], [], []>} : vector<8x64xf32>, vector<64x256xf32>, vector<8x256xf32> -> vector<8x256xf32>
    %78 = arith.addf %77, %57 : vector<8x256xf32>
    %79 = vector.broadcast %6 : vector<1x256xf32> to vector<8x256xf32>
    %80 = arith.addf %78, %79 : vector<8x256xf32>
    %81 = vector.extract_strided_slice %80 {offsets = [0, 0], sizes = [8, 192], strides = [1, 1]} : vector<8x256xf32> to vector<8x192xf32>
    %82 = arith.negf %81 : vector<8x192xf32>
    %83 = math.exp %82 : vector<8x192xf32>
    %cst_32 = arith.constant 1.000000e+00 : f32
    %84 = vector.broadcast %cst_32 : f32 to vector<8x192xf32>
    %85 = arith.addf %84, %83 : vector<8x192xf32>
    %86 = arith.divf %84, %85 : vector<8x192xf32>
    %87 = vector.extract_strided_slice %80 {offsets = [0, 192], sizes = [8, 64], strides = [1, 1]} : vector<8x256xf32> to vector<8x64xf32>
    %88 = math.tanh %87 : vector<8x64xf32>
    %89 = vector.extract_strided_slice %86 {offsets = [0, 0], sizes = [8, 64], strides = [1, 1]} : vector<8x192xf32> to vector<8x64xf32>
    %90 = vector.extract_strided_slice %86 {offsets = [0, 64], sizes = [8, 64], strides = [1, 1]} : vector<8x192xf32> to vector<8x64xf32>
    %91 = vector.extract_strided_slice %86 {offsets = [0, 128], sizes = [8, 64], strides = [1, 1]} : vector<8x192xf32> to vector<8x64xf32>
    %92 = arith.mulf %90, %51 : vector<8x64xf32>
    %93 = arith.mulf %89, %88 : vector<8x64xf32>
    %94 = arith.addf %92, %93 : vector<8x64xf32>
    %95 = math.tanh %94 : vector<8x64xf32>
    %96 = arith.mulf %91, %95 : vector<8x64xf32>
    %c0_33 = arith.constant 0 : index
    %c0_34 = arith.constant 0 : index
    %97 = vector.load %arg3[%c0_33, %c0_34] : memref<64x256xf32, #tpu.memory_space<vmem>>, vector<64x256xf32>
    %cst_35 = arith.constant dense<0.000000e+00> : vector<8x256xf32>
    %98 = tpu.matmul %75, %97, %cst_35 {dimension_numbers = #tpu.dot_dimension_numbers<[1], [0], [0], [1], [0, 0, 1, 1], [], []>} : vector<8x64xf32>, vector<64x256xf32>, vector<8x256xf32> -> vector<8x256xf32>
    %c0_36 = arith.constant 0 : index
    %c0_37 = arith.constant 0 : index
    %99 = vector.load %arg4[%c0_36, %c0_37] : memref<64x256xf32, #tpu.memory_space<vmem>>, vector<64x256xf32>
    %cst_38 = arith.constant dense<0.000000e+00> : vector<8x256xf32>
    %100 = tpu.matmul %96, %99, %cst_38 {dimension_numbers = #tpu.dot_dimension_numbers<[1], [0], [0], [1], [0, 0, 1, 1], [], []>} : vector<8x64xf32>, vector<64x256xf32>, vector<8x256xf32> -> vector<8x256xf32>
    %101 = vector.extract_strided_slice %5 {offsets = [16, 0], sizes = [8, 256], strides = [1, 1]} : vector<64x256xf32> to vector<8x256xf32>
    %102 = arith.addf %101, %98 : vector<8x256xf32>
    %103 = vector.extract_strided_slice %102 {offsets = [0, 0], sizes = [8, 192], strides = [1, 1]} : vector<8x256xf32> to vector<8x192xf32>
    %104 = arith.negf %103 : vector<8x192xf32>
    %105 = math.exp %104 : vector<8x192xf32>
    %cst_39 = arith.constant 1.000000e+00 : f32
    %106 = vector.broadcast %cst_39 : f32 to vector<8x192xf32>
    %107 = arith.addf %106, %105 : vector<8x192xf32>
    %108 = arith.divf %106, %107 : vector<8x192xf32>
    %109 = vector.extract_strided_slice %102 {offsets = [0, 192], sizes = [8, 64], strides = [1, 1]} : vector<8x256xf32> to vector<8x64xf32>
    %110 = math.tanh %109 : vector<8x64xf32>
    %111 = vector.extract_strided_slice %108 {offsets = [0, 0], sizes = [8, 64], strides = [1, 1]} : vector<8x192xf32> to vector<8x64xf32>
    %112 = vector.extract_strided_slice %108 {offsets = [0, 64], sizes = [8, 64], strides = [1, 1]} : vector<8x192xf32> to vector<8x64xf32>
    %113 = vector.extract_strided_slice %108 {offsets = [0, 128], sizes = [8, 64], strides = [1, 1]} : vector<8x192xf32> to vector<8x64xf32>
    %114 = arith.mulf %112, %73 : vector<8x64xf32>
    %115 = arith.mulf %111, %110 : vector<8x64xf32>
    %116 = arith.addf %114, %115 : vector<8x64xf32>
    %117 = math.tanh %116 : vector<8x64xf32>
    %118 = arith.mulf %113, %117 : vector<8x64xf32>
    %c0_40 = arith.constant 0 : index
    %c0_41 = arith.constant 0 : index
    %119 = vector.load %arg5[%c0_40, %c0_41] : memref<64x256xf32, #tpu.memory_space<vmem>>, vector<64x256xf32>
    %cst_42 = arith.constant dense<0.000000e+00> : vector<8x256xf32>
    %120 = tpu.matmul %118, %119, %cst_42 {dimension_numbers = #tpu.dot_dimension_numbers<[1], [0], [0], [1], [0, 0, 1, 1], [], []>} : vector<8x64xf32>, vector<64x256xf32>, vector<8x256xf32> -> vector<8x256xf32>
    %121 = arith.addf %120, %100 : vector<8x256xf32>
    %122 = vector.broadcast %6 : vector<1x256xf32> to vector<8x256xf32>
    %123 = arith.addf %121, %122 : vector<8x256xf32>
    %124 = vector.extract_strided_slice %123 {offsets = [0, 0], sizes = [8, 192], strides = [1, 1]} : vector<8x256xf32> to vector<8x192xf32>
    %125 = arith.negf %124 : vector<8x192xf32>
    %126 = math.exp %125 : vector<8x192xf32>
    %cst_43 = arith.constant 1.000000e+00 : f32
    %127 = vector.broadcast %cst_43 : f32 to vector<8x192xf32>
    %128 = arith.addf %127, %126 : vector<8x192xf32>
    %129 = arith.divf %127, %128 : vector<8x192xf32>
    %130 = vector.extract_strided_slice %123 {offsets = [0, 192], sizes = [8, 64], strides = [1, 1]} : vector<8x256xf32> to vector<8x64xf32>
    %131 = math.tanh %130 : vector<8x64xf32>
    %132 = vector.extract_strided_slice %129 {offsets = [0, 0], sizes = [8, 64], strides = [1, 1]} : vector<8x192xf32> to vector<8x64xf32>
    %133 = vector.extract_strided_slice %129 {offsets = [0, 64], sizes = [8, 64], strides = [1, 1]} : vector<8x192xf32> to vector<8x64xf32>
    %134 = vector.extract_strided_slice %129 {offsets = [0, 128], sizes = [8, 64], strides = [1, 1]} : vector<8x192xf32> to vector<8x64xf32>
    %135 = arith.mulf %133, %94 : vector<8x64xf32>
    %136 = arith.mulf %132, %131 : vector<8x64xf32>
    %137 = arith.addf %135, %136 : vector<8x64xf32>
    %138 = math.tanh %137 : vector<8x64xf32>
    %139 = arith.mulf %134, %138 : vector<8x64xf32>
    %c0_44 = arith.constant 0 : index
    %c0_45 = arith.constant 0 : index
    %140 = vector.load %arg3[%c0_44, %c0_45] : memref<64x256xf32, #tpu.memory_space<vmem>>, vector<64x256xf32>
    %cst_46 = arith.constant dense<0.000000e+00> : vector<8x256xf32>
    %141 = tpu.matmul %118, %140, %cst_46 {dimension_numbers = #tpu.dot_dimension_numbers<[1], [0], [0], [1], [0, 0, 1, 1], [], []>} : vector<8x64xf32>, vector<64x256xf32>, vector<8x256xf32> -> vector<8x256xf32>
    %c0_47 = arith.constant 0 : index
    %c0_48 = arith.constant 0 : index
    %142 = vector.load %arg4[%c0_47, %c0_48] : memref<64x256xf32, #tpu.memory_space<vmem>>, vector<64x256xf32>
    %cst_49 = arith.constant dense<0.000000e+00> : vector<8x256xf32>
    %143 = tpu.matmul %139, %142, %cst_49 {dimension_numbers = #tpu.dot_dimension_numbers<[1], [0], [0], [1], [0, 0, 1, 1], [], []>} : vector<8x64xf32>, vector<64x256xf32>, vector<8x256xf32> -> vector<8x256xf32>
    %144 = vector.extract_strided_slice %5 {offsets = [24, 0], sizes = [8, 256], strides = [1, 1]} : vector<64x256xf32> to vector<8x256xf32>
    %145 = arith.addf %144, %141 : vector<8x256xf32>
    %146 = vector.extract_strided_slice %145 {offsets = [0, 0], sizes = [8, 192], strides = [1, 1]} : vector<8x256xf32> to vector<8x192xf32>
    %147 = arith.negf %146 : vector<8x192xf32>
    %148 = math.exp %147 : vector<8x192xf32>
    %cst_50 = arith.constant 1.000000e+00 : f32
    %149 = vector.broadcast %cst_50 : f32 to vector<8x192xf32>
    %150 = arith.addf %149, %148 : vector<8x192xf32>
    %151 = arith.divf %149, %150 : vector<8x192xf32>
    %152 = vector.extract_strided_slice %145 {offsets = [0, 192], sizes = [8, 64], strides = [1, 1]} : vector<8x256xf32> to vector<8x64xf32>
    %153 = math.tanh %152 : vector<8x64xf32>
    %154 = vector.extract_strided_slice %151 {offsets = [0, 0], sizes = [8, 64], strides = [1, 1]} : vector<8x192xf32> to vector<8x64xf32>
    %155 = vector.extract_strided_slice %151 {offsets = [0, 64], sizes = [8, 64], strides = [1, 1]} : vector<8x192xf32> to vector<8x64xf32>
    %156 = vector.extract_strided_slice %151 {offsets = [0, 128], sizes = [8, 64], strides = [1, 1]} : vector<8x192xf32> to vector<8x64xf32>
    %157 = arith.mulf %155, %116 : vector<8x64xf32>
    %158 = arith.mulf %154, %153 : vector<8x64xf32>
    %159 = arith.addf %157, %158 : vector<8x64xf32>
    %160 = math.tanh %159 : vector<8x64xf32>
    %161 = arith.mulf %156, %160 : vector<8x64xf32>
    %c0_51 = arith.constant 0 : index
    %c0_52 = arith.constant 0 : index
    %162 = vector.load %arg5[%c0_51, %c0_52] : memref<64x256xf32, #tpu.memory_space<vmem>>, vector<64x256xf32>
    %cst_53 = arith.constant dense<0.000000e+00> : vector<8x256xf32>
    %163 = tpu.matmul %161, %162, %cst_53 {dimension_numbers = #tpu.dot_dimension_numbers<[1], [0], [0], [1], [0, 0, 1, 1], [], []>} : vector<8x64xf32>, vector<64x256xf32>, vector<8x256xf32> -> vector<8x256xf32>
    %164 = arith.addf %163, %143 : vector<8x256xf32>
    %165 = vector.broadcast %6 : vector<1x256xf32> to vector<8x256xf32>
    %166 = arith.addf %164, %165 : vector<8x256xf32>
    %167 = vector.extract_strided_slice %166 {offsets = [0, 0], sizes = [8, 192], strides = [1, 1]} : vector<8x256xf32> to vector<8x192xf32>
    %168 = arith.negf %167 : vector<8x192xf32>
    %169 = math.exp %168 : vector<8x192xf32>
    %cst_54 = arith.constant 1.000000e+00 : f32
    %170 = vector.broadcast %cst_54 : f32 to vector<8x192xf32>
    %171 = arith.addf %170, %169 : vector<8x192xf32>
    %172 = arith.divf %170, %171 : vector<8x192xf32>
    %173 = vector.extract_strided_slice %166 {offsets = [0, 192], sizes = [8, 64], strides = [1, 1]} : vector<8x256xf32> to vector<8x64xf32>
    %174 = math.tanh %173 : vector<8x64xf32>
    %175 = vector.extract_strided_slice %172 {offsets = [0, 0], sizes = [8, 64], strides = [1, 1]} : vector<8x192xf32> to vector<8x64xf32>
    %176 = vector.extract_strided_slice %172 {offsets = [0, 64], sizes = [8, 64], strides = [1, 1]} : vector<8x192xf32> to vector<8x64xf32>
    %177 = vector.extract_strided_slice %172 {offsets = [0, 128], sizes = [8, 64], strides = [1, 1]} : vector<8x192xf32> to vector<8x64xf32>
    %178 = arith.mulf %176, %137 : vector<8x64xf32>
    %179 = arith.mulf %175, %174 : vector<8x64xf32>
    %180 = arith.addf %178, %179 : vector<8x64xf32>
    %181 = math.tanh %180 : vector<8x64xf32>
    %182 = arith.mulf %177, %181 : vector<8x64xf32>
    %c0_55 = arith.constant 0 : index
    %c0_56 = arith.constant 0 : index
    %183 = vector.load %arg3[%c0_55, %c0_56] : memref<64x256xf32, #tpu.memory_space<vmem>>, vector<64x256xf32>
    %cst_57 = arith.constant dense<0.000000e+00> : vector<8x256xf32>
    %184 = tpu.matmul %161, %183, %cst_57 {dimension_numbers = #tpu.dot_dimension_numbers<[1], [0], [0], [1], [0, 0, 1, 1], [], []>} : vector<8x64xf32>, vector<64x256xf32>, vector<8x256xf32> -> vector<8x256xf32>
    %c0_58 = arith.constant 0 : index
    %c0_59 = arith.constant 0 : index
    %185 = vector.load %arg4[%c0_58, %c0_59] : memref<64x256xf32, #tpu.memory_space<vmem>>, vector<64x256xf32>
    %cst_60 = arith.constant dense<0.000000e+00> : vector<8x256xf32>
    %186 = tpu.matmul %182, %185, %cst_60 {dimension_numbers = #tpu.dot_dimension_numbers<[1], [0], [0], [1], [0, 0, 1, 1], [], []>} : vector<8x64xf32>, vector<64x256xf32>, vector<8x256xf32> -> vector<8x256xf32>
    %187 = vector.extract_strided_slice %5 {offsets = [32, 0], sizes = [8, 256], strides = [1, 1]} : vector<64x256xf32> to vector<8x256xf32>
    %188 = arith.addf %187, %184 : vector<8x256xf32>
    %189 = vector.extract_strided_slice %188 {offsets = [0, 0], sizes = [8, 192], strides = [1, 1]} : vector<8x256xf32> to vector<8x192xf32>
    %190 = arith.negf %189 : vector<8x192xf32>
    %191 = math.exp %190 : vector<8x192xf32>
    %cst_61 = arith.constant 1.000000e+00 : f32
    %192 = vector.broadcast %cst_61 : f32 to vector<8x192xf32>
    %193 = arith.addf %192, %191 : vector<8x192xf32>
    %194 = arith.divf %192, %193 : vector<8x192xf32>
    %195 = vector.extract_strided_slice %188 {offsets = [0, 192], sizes = [8, 64], strides = [1, 1]} : vector<8x256xf32> to vector<8x64xf32>
    %196 = math.tanh %195 : vector<8x64xf32>
    %197 = vector.extract_strided_slice %194 {offsets = [0, 0], sizes = [8, 64], strides = [1, 1]} : vector<8x192xf32> to vector<8x64xf32>
    %198 = vector.extract_strided_slice %194 {offsets = [0, 64], sizes = [8, 64], strides = [1, 1]} : vector<8x192xf32> to vector<8x64xf32>
    %199 = vector.extract_strided_slice %194 {offsets = [0, 128], sizes = [8, 64], strides = [1, 1]} : vector<8x192xf32> to vector<8x64xf32>
    %200 = arith.mulf %198, %159 : vector<8x64xf32>
    %201 = arith.mulf %197, %196 : vector<8x64xf32>
    %202 = arith.addf %200, %201 : vector<8x64xf32>
    %203 = math.tanh %202 : vector<8x64xf32>
    %204 = arith.mulf %199, %203 : vector<8x64xf32>
    %c0_62 = arith.constant 0 : index
    %c0_63 = arith.constant 0 : index
    %205 = vector.load %arg5[%c0_62, %c0_63] : memref<64x256xf32, #tpu.memory_space<vmem>>, vector<64x256xf32>
    %cst_64 = arith.constant dense<0.000000e+00> : vector<8x256xf32>
    %206 = tpu.matmul %204, %205, %cst_64 {dimension_numbers = #tpu.dot_dimension_numbers<[1], [0], [0], [1], [0, 0, 1, 1], [], []>} : vector<8x64xf32>, vector<64x256xf32>, vector<8x256xf32> -> vector<8x256xf32>
    %207 = arith.addf %206, %186 : vector<8x256xf32>
    %208 = vector.broadcast %6 : vector<1x256xf32> to vector<8x256xf32>
    %209 = arith.addf %207, %208 : vector<8x256xf32>
    %210 = vector.extract_strided_slice %209 {offsets = [0, 0], sizes = [8, 192], strides = [1, 1]} : vector<8x256xf32> to vector<8x192xf32>
    %211 = arith.negf %210 : vector<8x192xf32>
    %212 = math.exp %211 : vector<8x192xf32>
    %cst_65 = arith.constant 1.000000e+00 : f32
    %213 = vector.broadcast %cst_65 : f32 to vector<8x192xf32>
    %214 = arith.addf %213, %212 : vector<8x192xf32>
    %215 = arith.divf %213, %214 : vector<8x192xf32>
    %216 = vector.extract_strided_slice %209 {offsets = [0, 192], sizes = [8, 64], strides = [1, 1]} : vector<8x256xf32> to vector<8x64xf32>
    %217 = math.tanh %216 : vector<8x64xf32>
    %218 = vector.extract_strided_slice %215 {offsets = [0, 0], sizes = [8, 64], strides = [1, 1]} : vector<8x192xf32> to vector<8x64xf32>
    %219 = vector.extract_strided_slice %215 {offsets = [0, 64], sizes = [8, 64], strides = [1, 1]} : vector<8x192xf32> to vector<8x64xf32>
    %220 = vector.extract_strided_slice %215 {offsets = [0, 128], sizes = [8, 64], strides = [1, 1]} : vector<8x192xf32> to vector<8x64xf32>
    %221 = arith.mulf %219, %180 : vector<8x64xf32>
    %222 = arith.mulf %218, %217 : vector<8x64xf32>
    %223 = arith.addf %221, %222 : vector<8x64xf32>
    %224 = math.tanh %223 : vector<8x64xf32>
    %225 = arith.mulf %220, %224 : vector<8x64xf32>
    %c0_66 = arith.constant 0 : index
    %c0_67 = arith.constant 0 : index
    %226 = vector.load %arg3[%c0_66, %c0_67] : memref<64x256xf32, #tpu.memory_space<vmem>>, vector<64x256xf32>
    %cst_68 = arith.constant dense<0.000000e+00> : vector<8x256xf32>
    %227 = tpu.matmul %204, %226, %cst_68 {dimension_numbers = #tpu.dot_dimension_numbers<[1], [0], [0], [1], [0, 0, 1, 1], [], []>} : vector<8x64xf32>, vector<64x256xf32>, vector<8x256xf32> -> vector<8x256xf32>
    %c0_69 = arith.constant 0 : index
    %c0_70 = arith.constant 0 : index
    %228 = vector.load %arg4[%c0_69, %c0_70] : memref<64x256xf32, #tpu.memory_space<vmem>>, vector<64x256xf32>
    %cst_71 = arith.constant dense<0.000000e+00> : vector<8x256xf32>
    %229 = tpu.matmul %225, %228, %cst_71 {dimension_numbers = #tpu.dot_dimension_numbers<[1], [0], [0], [1], [0, 0, 1, 1], [], []>} : vector<8x64xf32>, vector<64x256xf32>, vector<8x256xf32> -> vector<8x256xf32>
    %230 = vector.extract_strided_slice %5 {offsets = [40, 0], sizes = [8, 256], strides = [1, 1]} : vector<64x256xf32> to vector<8x256xf32>
    %231 = arith.addf %230, %227 : vector<8x256xf32>
    %232 = vector.extract_strided_slice %231 {offsets = [0, 0], sizes = [8, 192], strides = [1, 1]} : vector<8x256xf32> to vector<8x192xf32>
    %233 = arith.negf %232 : vector<8x192xf32>
    %234 = math.exp %233 : vector<8x192xf32>
    %cst_72 = arith.constant 1.000000e+00 : f32
    %235 = vector.broadcast %cst_72 : f32 to vector<8x192xf32>
    %236 = arith.addf %235, %234 : vector<8x192xf32>
    %237 = arith.divf %235, %236 : vector<8x192xf32>
    %238 = vector.extract_strided_slice %231 {offsets = [0, 192], sizes = [8, 64], strides = [1, 1]} : vector<8x256xf32> to vector<8x64xf32>
    %239 = math.tanh %238 : vector<8x64xf32>
    %240 = vector.extract_strided_slice %237 {offsets = [0, 0], sizes = [8, 64], strides = [1, 1]} : vector<8x192xf32> to vector<8x64xf32>
    %241 = vector.extract_strided_slice %237 {offsets = [0, 64], sizes = [8, 64], strides = [1, 1]} : vector<8x192xf32> to vector<8x64xf32>
    %242 = vector.extract_strided_slice %237 {offsets = [0, 128], sizes = [8, 64], strides = [1, 1]} : vector<8x192xf32> to vector<8x64xf32>
    %243 = arith.mulf %241, %202 : vector<8x64xf32>
    %244 = arith.mulf %240, %239 : vector<8x64xf32>
    %245 = arith.addf %243, %244 : vector<8x64xf32>
    %246 = math.tanh %245 : vector<8x64xf32>
    %247 = arith.mulf %242, %246 : vector<8x64xf32>
    %c0_73 = arith.constant 0 : index
    %c0_74 = arith.constant 0 : index
    %248 = vector.load %arg5[%c0_73, %c0_74] : memref<64x256xf32, #tpu.memory_space<vmem>>, vector<64x256xf32>
    %cst_75 = arith.constant dense<0.000000e+00> : vector<8x256xf32>
    %249 = tpu.matmul %247, %248, %cst_75 {dimension_numbers = #tpu.dot_dimension_numbers<[1], [0], [0], [1], [0, 0, 1, 1], [], []>} : vector<8x64xf32>, vector<64x256xf32>, vector<8x256xf32> -> vector<8x256xf32>
    %250 = arith.addf %249, %229 : vector<8x256xf32>
    %251 = vector.broadcast %6 : vector<1x256xf32> to vector<8x256xf32>
    %252 = arith.addf %250, %251 : vector<8x256xf32>
    %253 = vector.extract_strided_slice %252 {offsets = [0, 0], sizes = [8, 192], strides = [1, 1]} : vector<8x256xf32> to vector<8x192xf32>
    %254 = arith.negf %253 : vector<8x192xf32>
    %255 = math.exp %254 : vector<8x192xf32>
    %cst_76 = arith.constant 1.000000e+00 : f32
    %256 = vector.broadcast %cst_76 : f32 to vector<8x192xf32>
    %257 = arith.addf %256, %255 : vector<8x192xf32>
    %258 = arith.divf %256, %257 : vector<8x192xf32>
    %259 = vector.extract_strided_slice %252 {offsets = [0, 192], sizes = [8, 64], strides = [1, 1]} : vector<8x256xf32> to vector<8x64xf32>
    %260 = math.tanh %259 : vector<8x64xf32>
    %261 = vector.extract_strided_slice %258 {offsets = [0, 0], sizes = [8, 64], strides = [1, 1]} : vector<8x192xf32> to vector<8x64xf32>
    %262 = vector.extract_strided_slice %258 {offsets = [0, 64], sizes = [8, 64], strides = [1, 1]} : vector<8x192xf32> to vector<8x64xf32>
    %263 = vector.extract_strided_slice %258 {offsets = [0, 128], sizes = [8, 64], strides = [1, 1]} : vector<8x192xf32> to vector<8x64xf32>
    %264 = arith.mulf %262, %223 : vector<8x64xf32>
    %265 = arith.mulf %261, %260 : vector<8x64xf32>
    %266 = arith.addf %264, %265 : vector<8x64xf32>
    %267 = math.tanh %266 : vector<8x64xf32>
    %268 = arith.mulf %263, %267 : vector<8x64xf32>
    %c0_77 = arith.constant 0 : index
    %c0_78 = arith.constant 0 : index
    %269 = vector.load %arg3[%c0_77, %c0_78] : memref<64x256xf32, #tpu.memory_space<vmem>>, vector<64x256xf32>
    %cst_79 = arith.constant dense<0.000000e+00> : vector<8x256xf32>
    %270 = tpu.matmul %247, %269, %cst_79 {dimension_numbers = #tpu.dot_dimension_numbers<[1], [0], [0], [1], [0, 0, 1, 1], [], []>} : vector<8x64xf32>, vector<64x256xf32>, vector<8x256xf32> -> vector<8x256xf32>
    %c0_80 = arith.constant 0 : index
    %c0_81 = arith.constant 0 : index
    %271 = vector.load %arg4[%c0_80, %c0_81] : memref<64x256xf32, #tpu.memory_space<vmem>>, vector<64x256xf32>
    %cst_82 = arith.constant dense<0.000000e+00> : vector<8x256xf32>
    %272 = tpu.matmul %268, %271, %cst_82 {dimension_numbers = #tpu.dot_dimension_numbers<[1], [0], [0], [1], [0, 0, 1, 1], [], []>} : vector<8x64xf32>, vector<64x256xf32>, vector<8x256xf32> -> vector<8x256xf32>
    %273 = vector.extract_strided_slice %5 {offsets = [48, 0], sizes = [8, 256], strides = [1, 1]} : vector<64x256xf32> to vector<8x256xf32>
    %274 = arith.addf %273, %270 : vector<8x256xf32>
    %275 = vector.extract_strided_slice %274 {offsets = [0, 0], sizes = [8, 192], strides = [1, 1]} : vector<8x256xf32> to vector<8x192xf32>
    %276 = arith.negf %275 : vector<8x192xf32>
    %277 = math.exp %276 : vector<8x192xf32>
    %cst_83 = arith.constant 1.000000e+00 : f32
    %278 = vector.broadcast %cst_83 : f32 to vector<8x192xf32>
    %279 = arith.addf %278, %277 : vector<8x192xf32>
    %280 = arith.divf %278, %279 : vector<8x192xf32>
    %281 = vector.extract_strided_slice %274 {offsets = [0, 192], sizes = [8, 64], strides = [1, 1]} : vector<8x256xf32> to vector<8x64xf32>
    %282 = math.tanh %281 : vector<8x64xf32>
    %283 = vector.extract_strided_slice %280 {offsets = [0, 0], sizes = [8, 64], strides = [1, 1]} : vector<8x192xf32> to vector<8x64xf32>
    %284 = vector.extract_strided_slice %280 {offsets = [0, 64], sizes = [8, 64], strides = [1, 1]} : vector<8x192xf32> to vector<8x64xf32>
    %285 = vector.extract_strided_slice %280 {offsets = [0, 128], sizes = [8, 64], strides = [1, 1]} : vector<8x192xf32> to vector<8x64xf32>
    %286 = arith.mulf %284, %245 : vector<8x64xf32>
    %287 = arith.mulf %283, %282 : vector<8x64xf32>
    %288 = arith.addf %286, %287 : vector<8x64xf32>
    %289 = math.tanh %288 : vector<8x64xf32>
    %290 = arith.mulf %285, %289 : vector<8x64xf32>
    %c0_84 = arith.constant 0 : index
    %c0_85 = arith.constant 0 : index
    %291 = vector.load %arg5[%c0_84, %c0_85] : memref<64x256xf32, #tpu.memory_space<vmem>>, vector<64x256xf32>
    %cst_86 = arith.constant dense<0.000000e+00> : vector<8x256xf32>
    %292 = tpu.matmul %290, %291, %cst_86 {dimension_numbers = #tpu.dot_dimension_numbers<[1], [0], [0], [1], [0, 0, 1, 1], [], []>} : vector<8x64xf32>, vector<64x256xf32>, vector<8x256xf32> -> vector<8x256xf32>
    %293 = arith.addf %292, %272 : vector<8x256xf32>
    %294 = vector.broadcast %6 : vector<1x256xf32> to vector<8x256xf32>
    %295 = arith.addf %293, %294 : vector<8x256xf32>
    %296 = vector.extract_strided_slice %295 {offsets = [0, 0], sizes = [8, 192], strides = [1, 1]} : vector<8x256xf32> to vector<8x192xf32>
    %297 = arith.negf %296 : vector<8x192xf32>
    %298 = math.exp %297 : vector<8x192xf32>
    %cst_87 = arith.constant 1.000000e+00 : f32
    %299 = vector.broadcast %cst_87 : f32 to vector<8x192xf32>
    %300 = arith.addf %299, %298 : vector<8x192xf32>
    %301 = arith.divf %299, %300 : vector<8x192xf32>
    %302 = vector.extract_strided_slice %295 {offsets = [0, 192], sizes = [8, 64], strides = [1, 1]} : vector<8x256xf32> to vector<8x64xf32>
    %303 = math.tanh %302 : vector<8x64xf32>
    %304 = vector.extract_strided_slice %301 {offsets = [0, 0], sizes = [8, 64], strides = [1, 1]} : vector<8x192xf32> to vector<8x64xf32>
    %305 = vector.extract_strided_slice %301 {offsets = [0, 64], sizes = [8, 64], strides = [1, 1]} : vector<8x192xf32> to vector<8x64xf32>
    %306 = vector.extract_strided_slice %301 {offsets = [0, 128], sizes = [8, 64], strides = [1, 1]} : vector<8x192xf32> to vector<8x64xf32>
    %307 = arith.mulf %305, %266 : vector<8x64xf32>
    %308 = arith.mulf %304, %303 : vector<8x64xf32>
    %309 = arith.addf %307, %308 : vector<8x64xf32>
    %310 = math.tanh %309 : vector<8x64xf32>
    %311 = arith.mulf %306, %310 : vector<8x64xf32>
    %c0_88 = arith.constant 0 : index
    %c0_89 = arith.constant 0 : index
    %312 = vector.load %arg3[%c0_88, %c0_89] : memref<64x256xf32, #tpu.memory_space<vmem>>, vector<64x256xf32>
    %cst_90 = arith.constant dense<0.000000e+00> : vector<8x256xf32>
    %313 = tpu.matmul %290, %312, %cst_90 {dimension_numbers = #tpu.dot_dimension_numbers<[1], [0], [0], [1], [0, 0, 1, 1], [], []>} : vector<8x64xf32>, vector<64x256xf32>, vector<8x256xf32> -> vector<8x256xf32>
    %c0_91 = arith.constant 0 : index
    %c0_92 = arith.constant 0 : index
    %314 = vector.load %arg4[%c0_91, %c0_92] : memref<64x256xf32, #tpu.memory_space<vmem>>, vector<64x256xf32>
    %cst_93 = arith.constant dense<0.000000e+00> : vector<8x256xf32>
    %315 = tpu.matmul %311, %314, %cst_93 {dimension_numbers = #tpu.dot_dimension_numbers<[1], [0], [0], [1], [0, 0, 1, 1], [], []>} : vector<8x64xf32>, vector<64x256xf32>, vector<8x256xf32> -> vector<8x256xf32>
    %316 = vector.extract_strided_slice %5 {offsets = [56, 0], sizes = [8, 256], strides = [1, 1]} : vector<64x256xf32> to vector<8x256xf32>
    %317 = arith.addf %316, %313 : vector<8x256xf32>
    %318 = vector.extract_strided_slice %317 {offsets = [0, 0], sizes = [8, 192], strides = [1, 1]} : vector<8x256xf32> to vector<8x192xf32>
    %319 = arith.negf %318 : vector<8x192xf32>
    %320 = math.exp %319 : vector<8x192xf32>
    %cst_94 = arith.constant 1.000000e+00 : f32
    %321 = vector.broadcast %cst_94 : f32 to vector<8x192xf32>
    %322 = arith.addf %321, %320 : vector<8x192xf32>
    %323 = arith.divf %321, %322 : vector<8x192xf32>
    %324 = vector.extract_strided_slice %317 {offsets = [0, 192], sizes = [8, 64], strides = [1, 1]} : vector<8x256xf32> to vector<8x64xf32>
    %325 = math.tanh %324 : vector<8x64xf32>
    %326 = vector.extract_strided_slice %323 {offsets = [0, 0], sizes = [8, 64], strides = [1, 1]} : vector<8x192xf32> to vector<8x64xf32>
    %327 = vector.extract_strided_slice %323 {offsets = [0, 64], sizes = [8, 64], strides = [1, 1]} : vector<8x192xf32> to vector<8x64xf32>
    %328 = vector.extract_strided_slice %323 {offsets = [0, 128], sizes = [8, 64], strides = [1, 1]} : vector<8x192xf32> to vector<8x64xf32>
    %329 = arith.mulf %327, %288 : vector<8x64xf32>
    %330 = arith.mulf %326, %325 : vector<8x64xf32>
    %331 = arith.addf %329, %330 : vector<8x64xf32>
    %332 = math.tanh %331 : vector<8x64xf32>
    %333 = arith.mulf %328, %332 : vector<8x64xf32>
    %c0_95 = arith.constant 0 : index
    %c0_96 = arith.constant 0 : index
    %334 = vector.load %arg5[%c0_95, %c0_96] : memref<64x256xf32, #tpu.memory_space<vmem>>, vector<64x256xf32>
    %cst_97 = arith.constant dense<0.000000e+00> : vector<8x256xf32>
    %335 = tpu.matmul %333, %334, %cst_97 {dimension_numbers = #tpu.dot_dimension_numbers<[1], [0], [0], [1], [0, 0, 1, 1], [], []>} : vector<8x64xf32>, vector<64x256xf32>, vector<8x256xf32> -> vector<8x256xf32>
    %336 = arith.addf %335, %315 : vector<8x256xf32>
    %337 = vector.broadcast %6 : vector<1x256xf32> to vector<8x256xf32>
    %338 = arith.addf %336, %337 : vector<8x256xf32>
    %339 = vector.extract_strided_slice %338 {offsets = [0, 0], sizes = [8, 192], strides = [1, 1]} : vector<8x256xf32> to vector<8x192xf32>
    %340 = arith.negf %339 : vector<8x192xf32>
    %341 = math.exp %340 : vector<8x192xf32>
    %cst_98 = arith.constant 1.000000e+00 : f32
    %342 = vector.broadcast %cst_98 : f32 to vector<8x192xf32>
    %343 = arith.addf %342, %341 : vector<8x192xf32>
    %344 = arith.divf %342, %343 : vector<8x192xf32>
    %345 = vector.extract_strided_slice %338 {offsets = [0, 192], sizes = [8, 64], strides = [1, 1]} : vector<8x256xf32> to vector<8x64xf32>
    %346 = math.tanh %345 : vector<8x64xf32>
    %347 = vector.extract_strided_slice %344 {offsets = [0, 0], sizes = [8, 64], strides = [1, 1]} : vector<8x192xf32> to vector<8x64xf32>
    %348 = vector.extract_strided_slice %344 {offsets = [0, 64], sizes = [8, 64], strides = [1, 1]} : vector<8x192xf32> to vector<8x64xf32>
    %349 = vector.extract_strided_slice %344 {offsets = [0, 128], sizes = [8, 64], strides = [1, 1]} : vector<8x192xf32> to vector<8x64xf32>
    %350 = arith.mulf %348, %309 : vector<8x64xf32>
    %351 = arith.mulf %347, %346 : vector<8x64xf32>
    %352 = arith.addf %350, %351 : vector<8x64xf32>
    %353 = math.tanh %352 : vector<8x64xf32>
    %354 = arith.mulf %349, %353 : vector<8x64xf32>
    %c0_99 = arith.constant 0 : index
    %c0_100 = arith.constant 0 : index
    %355 = vector.load %arg7[%c0_99, %c0_100] : memref<64x128xf32, #tpu.memory_space<vmem>>, vector<64x128xf32>
    %cst_101 = arith.constant dense<0.000000e+00> : vector<8x128xf32>
    %356 = tpu.matmul %354, %355, %cst_101 {dimension_numbers = #tpu.dot_dimension_numbers<[1], [0], [0], [1], [0, 0, 1, 1], [], []>} : vector<8x64xf32>, vector<64x128xf32>, vector<8x128xf32> -> vector<8x128xf32>
    %c0_102 = arith.constant 0 : index
    %c0_103 = arith.constant 0 : index
    %357 = vector.load %arg8[%c0_102, %c0_103] : memref<1x128xf32, #tpu.memory_space<vmem>>, vector<1x128xf32>
    %358 = vector.broadcast %357 : vector<1x128xf32> to vector<8x128xf32>
    %359 = arith.addf %356, %358 : vector<8x128xf32>
    %c0_104 = arith.constant 0 : index
    %c0_105 = arith.constant 0 : index
    %360 = vector.load %arg9[%c0_104, %c0_105] : memref<8x128xf32, #tpu.memory_space<vmem>>, vector<8x128xf32>
    tpu.vector_store %arg9[%c0_104, %c0_105], %359 {strides = array<i32>} : memref<8x128xf32, #tpu.memory_space<vmem>>, vector<8x128xf32>,
    return
  }
}

</mosaic_0001>

<bundles_post_ra>
// kernel: tpu_custom_call.1
= control target key start
LH: loop header
LB: loop body
LE: loop exit
PB: predicated region body
PF: predicated region fallthrough
CT: control target
= control target key end

     0   :  { %14 = vsyncpa [#allocation3], 0  ;;  %s4153_s0 = inlined_call_operand.vmem [shape: f32[64,8], index: 0, kind: input, shape index: {}]   ;;  %s4154_s1 = inlined_call_operand.vmem [shape: f32[8,256], index: 1, kind: input, shape index: {}]   ;;  %s4155_s2 = inlined_call_operand.vmem [shape: f32[1,256], index: 2, kind: input, shape index: {}]   ;;  %s4156_s3 = inlined_call_operand.hbm [shape: f32[64,256], index: 3, kind: input, shape index: {}]   ;;  %s4157_s4 = inlined_call_operand.hbm [shape: f32[64,256], index: 4, kind: input, shape index: {}]   ;;  %s4158_s5 = inlined_call_operand.hbm [shape: f32[64,256], index: 5, kind: input, shape index: {}]   ;;  %s4159_s6 = inlined_call_operand.vmem [shape: f32[1,256], index: 6, kind: input, shape index: {}]   ;;  %s4160_s7 = inlined_call_operand.vmem [shape: f32[64,128], index: 7, kind: input, shape index: {}]   ;;  %s4161_s8 = inlined_call_operand.vmem [shape: f32[1,128], index: 8, kind: input, shape index: {}]   ;;  %s4162_s9 = inlined_call_operand.hbm [shape: f32[8,128], index: 9, kind: output, shape index: {}]  }
   0x1   :  { %15 = vsyncpa [#allocation6], 0 }
   0x2   :  { %16 = vsyncpa [#allocation4], 0  ;;  %s3496_s30 = smov [#allocation5]   ;;  %s3497_s11 = smov [#allocation2]  }
   0x3   :  { %s40_s10 = sshll.u32 %s3496_s30, 4  ;;  %s28_s12 = sshll.u32 %s3497_s11, 4  ;;  %s41_s10 = int_to_ptr.vmem [resolvable:$true] %s40_s10  ;;  %s3556_s12 = int_to_ptr.vmem [resolvable:$true] %s28_s12 }
   0x4   :  { %s3402_s15 = scalar_lea.hbm %s4157_s4, 2048 }
   0x5   :  { %p3403_p0 = scmp.ne.s32.totalorder %s4157_s4, %s3402_s15  ;;  %p3406_p1 = scmp.lt.u32.totalorder %s3402_s15, %s4157_s4 }
   0x7   :  { %p3408_p2 = pnand %p3406_p1, %p3403_p0 }
   0x9   :  { %3411 = shalt.err (!%p3408_p2)
}
   0xa   :  { %s3412_s20 = scalar_lea.vmem %s41_s10, 2048  ;;  %p3417_p4 = scmp.lt.s32.totalorder %s41_s10, %s41_s10 }
   0xb   :  { %p3413_p3 = scmp.ne.s32.totalorder %s41_s10, %s3412_s20  ;;  %p3418_p5 = scmp.lt.s32.totalorder %s3412_s20, %s3412_s20 }
   0xd   :  { %p3419_p6 = por %p3418_p5, %p3417_p4 }
   0xf   :  { %p3420_p7 = pnand %p3419_p6, %p3413_p3 }
  0x11   :  { %3423 = shalt.err (!%p3420_p7)
}
  0x12   :  { %s3498_s21 = smov 256   ;;  %s3499_s22 = smov 16  }
  0x13   :  { %46 = dma.hbm_to_vmem [thread:$0]  %s4157_s4, 2048, %s41_s10, [#allocation6], %s3498_s21, %s3498_s21, %s3499_s22  }
  0x14   :  { %s3424_s27 = scalar_lea.hbm %s4156_s3, 2048 }
  0x15   :  { %p3425_p8 = scmp.ne.s32.totalorder %s4156_s3, %s3424_s27  ;;  %p3428_p9 = scmp.lt.u32.totalorder %s3424_s27, %s4156_s3 }
  0x17   :  { %p3430_p10 = pnand %p3428_p9, %p3425_p8 }
  0x19   :  { %3433 = shalt.err (!%p3430_p10)
}
  0x1a   :  { %s3434_s13 = scalar_lea.vmem %s3556_s12, 2048  ;;  %p3439_p12 = scmp.lt.s32.totalorder %s3556_s12, %s3556_s12 }
  0x1b   :  { %p3435_p11 = scmp.ne.s32.totalorder %s3556_s12, %s3434_s13  ;;  %p3440_p13 = scmp.lt.s32.totalorder %s3434_s13, %s3434_s13 }
  0x1d   :  { %p3441_p0 = por %p3440_p13, %p3439_p12 }
  0x1f   :  { %p3442_p1 = pnand %p3441_p0, %p3435_p11 }
  0x21   :  { %3445 = shalt.err (!%p3442_p1)
}
  0x22   :  { %34 = dma.hbm_to_vmem [thread:$0]  %s4156_s3, 2048, %s3556_s12, [#allocation3], %s3498_s21, %s3498_s21, %s3499_s22  }
  0x23   :  { %s3500_s14 = smov [#allocation7]   ;;  %s3446_s18 = scalar_lea.hbm %s4158_s5, 2048 }
  0x24   :  { %s52_s15 = sshll.u32 %s3500_s14, 4  ;;  %p3447_p2 = scmp.ne.s32.totalorder %s4158_s5, %s3446_s18  ;;  %s53_s15 = int_to_ptr.vmem [resolvable:$true] %s52_s15 }
  0x25   :  { %p3450_p3 = scmp.lt.u32.totalorder %s3446_s18, %s4158_s5 }
  0x27   :  { %p3452_p4 = pnand %p3450_p3, %p3447_p2 }
  0x29   :  { %3455 = shalt.err (!%p3452_p4)
}
  0x2a   :  { %s3456_s25 = scalar_lea.vmem %s53_s15, 2048  ;;  %p3461_p6 = scmp.lt.s32.totalorder %s53_s15, %s53_s15 }
  0x2b   :  { %p3457_p5 = scmp.ne.s32.totalorder %s53_s15, %s3456_s25  ;;  %p3462_p7 = scmp.lt.s32.totalorder %s3456_s25, %s3456_s25 }
  0x2d   :  { %p3463_p8 = por %p3462_p7, %p3461_p6 }
  0x2f   :  { %p3464_p9 = pnand %p3463_p8, %p3457_p5 }
  0x31   :  { %3467 = shalt.err (!%p3464_p9)
}
  0x32   :  { %58 = dma.hbm_to_vmem [thread:$0]  %s4158_s5, 2048, %s53_s15, [#allocation6], %s3498_s21, %s3498_s21, %s3499_s22  }
  0x33   :  { %3490 = dma.done.wait [#allocation3], 2048  }
  0x34   :  { %3491 = vsyncadd [#allocation3], 4294965248 }
  0x35   :  { %3492 = dma.done.wait [#allocation6], 4096  }
  0x36   :  { %3493 = vsyncadd [#allocation6], 4294963200  ;;  %v3501_v0 = vmov 0.0   ;;  %v83_v1 = vld [vmem:[%s4154_s1 + $0x8] sm:$0xff]  ;;  %v82_v2 = vld [vmem:[%s4154_s1] sm:$0xff]  ;;  %vm96_vm0 = vcmask 64512   ;;  %v86_v35 = vlaneseq }
  0x37   :  { %185 = vmatprep.mubr.f32.mxu0 %v3501_v0  ;;  %406 = vmatprep.mubr.f32.mxu1 %v3501_v0  ;;  %v74_v3 = vld [vmem:[%s4153_s0] sm:$0xff]  ;;  %v236_v4 = vld [vmem:[#allocation2 + $0x8] sm:$0xff]  ;;  %v238_v5 = vld [vmem:[#allocation2 + $0x18] sm:$0xff]  ;;  %s3502_s24 = smov 64   ;;  %vm251_vm1 = vcmask 523264   ;;  %vm3504_vm2 = vmmov 0  }
  0x38   :  { %121 = vmatprep.subr.mxu0 %v83_v1  ;;  %v235_v6 = vld [vmem:[#allocation2] sm:$0xff]  ;;  %v3619_v7 = vpack.c.bf16 %v238_v5, %v236_v4  ;;  %v237_v8 = vld [vmem:[#allocation2 + $0x10] sm:$0xff]  ;;  %v240_v10 = vld [vmem:[#allocation2 + $0x28] sm:$0xff]  ;;  %v3691_v36 = vshrl.u32 %v86_v35, 7  ;;  %s3505_s15 = smov [#allocation8]  }
  0x39   :  { %122 = vmatpush1.msra.mxu0 %v82_v2  ;;  %v3622_v9 = vpack.c.bf16 %v237_v8, %v235_v6  ;;  %v242_v11 = vld [vmem:[#allocation2 + $0x38] sm:$0xff]  ;;  %v239_v12 = vld [vmem:[#allocation2 + $0x20] sm:$0xff]  ;;  %v241_v15 = vld [vmem:[#allocation2 + $0x30] sm:$0xff]  ;;  %s2654_s16 = sshll.u32 %s3505_s15, 4  ;;  %s2655_s16 = int_to_ptr.vmem [resolvable:$true] %s2654_s16 }
  0x3a   :  { %2664 = vmatmul.mubr.msk.f32.vlgmr.msra.gmra.mrb[0].mxu0 %vm96_vm0, %v74_v3  ;;  %2757 = vmatprep.subr.bf16.mxu0 %v3619_v7  ;;  %v75_v13 = vld [vmem:[%s4153_s0 + $0x8] sm:$0xff]  ;;  %v3629_v14 = vpack.c.bf16 %v242_v11, %v240_v10  ;;  %v3632_v16 = vpack.c.bf16 %v241_v15, %v239_v12  ;;  %v244_v17 = vld [vmem:[#allocation2 + $0x48] sm:$0xff]  ;;  %v243_v20 = vld [vmem:[#allocation2 + $0x40] sm:$0xff]  ;;  %v92_v37 = vsub.s32 1, %v3691_v36  ;;  %v88_v44 = vsub.s32 0, %v3691_v36  ;;  %s3468_s17 = scalar_lea.vmem %s2655_s16, 128  ;;  %p3473_p11 = scmp.lt.s32.totalorder %s2655_s16, %s2655_s16 }
  0x3b   :  { %191 = vmatprep.mubr.f32.mxu0 %v3501_v0  ;;  %2759 = vmatpush1.bf16.msra.mxu0 %v3622_v9  ;;  %v246_v18 = vld [vmem:[#allocation2 + $0x58] sm:$0xff]  ;;  %v245_v21 = vld [vmem:[#allocation2 + $0x50] sm:$0xff]  ;;  %v248_v22 = vld [vmem:[#allocation2 + $0x68] sm:$0xff]  ;;  %p3469_p10 = scmp.ne.s32.totalorder %s2655_s16, %s3468_s17  ;;  %p3474_p12 = scmp.lt.s32.totalorder %s3468_s17, %s3468_s17 }
  0x3c   :  { %2761 = vmatprep.subr.bf16.mxu0 %v3629_v14  ;;  %v3635_v19 = vpack.c.bf16 %v246_v18, %v244_v17  ;;  %v250_v23 = vld [vmem:[#allocation2 + $0x78] sm:$0xff]  ;;  %v76_v24 = vld [vmem:[%s4153_s0 + $0x10] sm:$0xff]  ;;  %v3643_v25 = vpack.c.bf16 %v245_v21, %v243_v20  ;;  %v249_v28 = vld [vmem:[#allocation2 + $0x70] sm:$0xff] }
  0x3d   :  { %v3646_v26 = vpack.c.bf16 %v250_v23, %v248_v22  ;;  %v247_v27 = vld [vmem:[#allocation2 + $0x60] sm:$0xff]  ;;  %v77_v29 = vld [vmem:[%s4153_s0 + $0x18] sm:$0xff]  ;;  %v78_v31 = vld [vmem:[%s4153_s0 + $0x20] sm:$0xff]  ;;  %p3475_p13 = por %p3474_p12, %p3473_p11 }
  0x3e   :  { %2665 = vmatmul.mubr.msk.f32.gmra.mrb[2].mxu0 %vm96_vm0, %v75_v13  ;;  %v3654_v30 = vpack.c.bf16 %v249_v28, %v247_v27  ;;  %v79_v32 = vld [vmem:[%s4153_s0 + $0x28] sm:$0xff]  ;;  %v80_v33 = vld [vmem:[%s4153_s0 + $0x30] sm:$0xff]  ;;  %v81_v34 = vld [vmem:[%s4153_s0 + $0x38] sm:$0xff] }
  0x3f   :  { %197 = vmatprep.mubr.f32.mxu0 %v3501_v0  ;;  %2763 = vmatpush1.bf16.msra.mxu0 %v3632_v16  ;;  %v84_v38 = vld [vmem:[%s4155_s2] sm:$0x3]  ;;  %v327_v53 = vld [vmem:[#allocation5 + $0x8] sm:$0xff]  ;;  %v329_v54 = vld [vmem:[#allocation5 + $0x18] sm:$0xff]  ;;  %p3476_p0 = pnand %p3475_p13, %p3469_p10 }
  0x40   :  { %2765 = vmatprep.subr.bf16.mxu0 %v3635_v19  ;;  %v3699_v39 = vrot.slane %v84_v38, %v92_v37  ;;  %v3709_v45 = vrot.slane %v84_v38, %v88_v44  ;;  %v326_v55 = vld [vmem:[#allocation5] sm:$0xff]  ;;  %v3716_v56 = vpack.c.bf16 %v329_v54, %v327_v53  ;;  %v328_v57 = vld [vmem:[#allocation5 + $0x10] sm:$0xff]  ;;  %v331_v58 = vld [vmem:[#allocation5 + $0x28] sm:$0xff] }
  0x41   :  { %v333_v59 = vld [vmem:[#allocation5 + $0x38] sm:$0xff]  ;;  %v3718_v60 = vpack.c.bf16 %v328_v57, %v326_v55  ;;  %v330_v62 = vld [vmem:[#allocation5 + $0x20] sm:$0xff]  ;;  %v332_v63 = vld [vmem:[#allocation5 + $0x30] sm:$0xff] }
  0x42   :  { %2666 = vmatmul.mubr.msk.f32.gmra.mrb[4].mxu0 %vm96_vm0, %v76_v24  ;;  %v3720_v61 = vpack.c.bf16 %v333_v59, %v331_v58  ;;  %v335_v1 = vld [vmem:[#allocation5 + $0x48] sm:$0xff]  ;;  %2773 = vmatprep.subr.bf16.mxu1 %v3716_v56  ;;  %v337_v2 = vld [vmem:[#allocation5 + $0x58] sm:$0xff]  ;;  %v3724_v3 = vpack.c.bf16 %v332_v63, %v330_v62  ;;  %v334_v5 = vld [vmem:[#allocation5 + $0x40] sm:$0xff] }
  0x43   :  { %203 = vmatprep.mubr.f32.mxu0 %v3501_v0  ;;  %2767 = vmatpush1.bf16.msra.mxu0 %v3643_v25  ;;  %v3727_v4 = vpack.c.bf16 %v337_v2, %v335_v1  ;;  %v336_v6 = vld [vmem:[#allocation5 + $0x50] sm:$0xff]  ;;  %v339_v8 = vld [vmem:[#allocation5 + $0x68] sm:$0xff]  ;;  %v341_v10 = vld [vmem:[#allocation5 + $0x78] sm:$0xff] }
  0x44   :  { %2769 = vmatprep.subr.bf16.mxu0 %v3646_v26  ;;  %2775 = vmatpush1.bf16.msra.mxu1 %v3718_v60  ;;  %v3730_v11 = vpack.c.bf16 %v336_v6, %v334_v5  ;;  %v3733_v12 = vpack.c.bf16 %v341_v10, %v339_v8  ;;  %v338_v13 = vld [vmem:[#allocation5 + $0x60] sm:$0xff]  ;;  %v340_v15 = vld [vmem:[#allocation5 + $0x70] sm:$0xff]  ;;  %v446_v17 = vld [vmem:[#allocation7 + $0x8] sm:$0xff] }
  0x45   :  { %2777 = vmatprep.subr.bf16.mxu1 %v3720_v61  ;;  %v448_v18 = vld [vmem:[#allocation7 + $0x18] sm:$0xff]  ;;  %v3736_v20 = vpack.c.bf16 %v340_v15, %v338_v13  ;;  %v445_v22 = vld [vmem:[#allocation7] sm:$0xff]  ;;  %v447_v23 = vld [vmem:[#allocation7 + $0x10] sm:$0xff] }
  0x46   :  { %2667 = vmatmul.mubr.msk.f32.gmra.mrb[6].mxu0 %vm96_vm0, %v77_v29  ;;  %v3739_v21 = vpack.c.bf16 %v448_v18, %v446_v17  ;;  %v450_v24 = vld [vmem:[#allocation7 + $0x28] sm:$0xff]  ;;  %v452_v27 = vld [vmem:[#allocation7 + $0x38] sm:$0xff]  ;;  %v3742_v28 = vpack.c.bf16 %v447_v23, %v445_v22 }
  0x47   :  { %209 = vmatprep.mubr.f32.mxu0 %v3501_v0  ;;  %2771 = vmatpush1.bf16.msra.mxu0 %v3654_v30  ;;  %v3745_v29 = vpack.c.bf16 %v452_v27, %v450_v24 }
  0x48   :  { %2805 = vmatprep.subr.bf16.mxu0 %v3619_v7  ;;  %2779 = vmatpush1.bf16.msra.mxu1 %v3724_v3 }
  0x49   :  { %2781 = vmatprep.subr.bf16.mxu1 %v3727_v4 }
  0x4a   :  { %2668 = vmatmul.mubr.msk.f32.gmra.mrb[8].mxu0 %vm96_vm0, %v78_v31  ;;  %v449_v31 = vld [vmem:[#allocation7 + $0x20] sm:$0xff] }
  0x4b   :  { %215 = vmatprep.mubr.f32.mxu0 %v3501_v0 }
  0x4c   :  { %2783 = vmatpush1.bf16.msra.mxu1 %v3730_v11 }
  0x4d   :  { %2785 = vmatprep.subr.bf16.mxu1 %v3733_v12 }
  0x4e   :  { %2669 = vmatmul.mubr.msk.f32.gmra.mrb[10].mxu0 %vm96_vm0, %v79_v32  ;;  %v451_v32 = vld [vmem:[#allocation7 + $0x30] sm:$0xff] }
  0x4f   :  { %221 = vmatprep.mubr.f32.mxu0 %v3501_v0  ;;  %v3749_v35 = vpack.c.bf16 %v451_v32, %v449_v31 }
  0x50   :  { %2787 = vmatpush1.bf16.msra.mxu1 %v3736_v20 }
  0x51   :  { %2789 = vmatprep.subr.bf16.mxu1 %v3739_v21 }
  0x52   :  { %2670 = vmatmul.mubr.msk.f32.gmra.mrb[12].mxu0 %vm96_vm0, %v80_v33  ;;  %v454_v33 = vld [vmem:[#allocation7 + $0x48] sm:$0xff] }
  0x53   :  { %227 = vmatprep.mubr.f32.mxu0 %v3501_v0  ;;  %407 = vmatmul.mubr.f32.vlgmr.msra.gmra.mrb[0].mxu1 %v3501_v0 }
  0x54   :  { %2791 = vmatpush1.bf16.msra.mxu1 %v3742_v28  ;;  %528 = vmatprep.mubr.f32.mxu1 %v3501_v0 }
  0x55   :  { %2793 = vmatprep.subr.bf16.mxu1 %v3745_v29 }
  0x56   :  { %2671 = vmatmul.mubr.msk.f32.gmra.mrb[14].mxu0 %vm96_vm0, %v81_v34  ;;  %v456_v34 = vld [vmem:[#allocation7 + $0x58] sm:$0xff] }
  0x57   :  { %319 = vmatprep.mubr.f32.mxu0 %v3501_v0  ;;  %v3753_v38 = vpack.c.bf16 %v456_v34, %v454_v33 }
  0x58   :  { %2795 = vmatpush1.bf16.msra.mxu1 %v3749_v35 }
  0x59   :  { %2797 = vmatprep.subr.bf16.mxu1 %v3753_v38 }
  0x5a   :  { %320 = vmatmul.mubr.f32.vlgmr.msra.gmra.mrb[0].mxu0 %v3501_v0 }
  0x5b   :  { %2807 = vmatpush1.bf16.msra.mxu0 %v3622_v9  ;;  %642 = vmatprep.mubr.f32.mxu0 %v3501_v0 }
  0x5c   :  { %2809 = vmatprep.subr.bf16.mxu0 %v3629_v14 }
  0x5f   :  { %2811 = vmatpush1.bf16.msra.mxu0 %v3632_v16 }
  0x60   :  { %2813 = vmatprep.subr.bf16.mxu0 %v3635_v19 }
  0x63   :  { %2815 = vmatpush1.bf16.msra.mxu0 %v3643_v25 }
  0x64   :  { %2817 = vmatprep.subr.bf16.mxu0 %v3646_v26 }
  0x67   :  { %2819 = vmatpush1.bf16.msra.mxu0 %v3654_v30 }
  0x68   :  { %2853 = vmatprep.subr.bf16.mxu0 %v3619_v7 }
 0x12d   :  { %v321_v40 = vpop.f32.mrb[0].mxu0 }
 0x12e   :  { %v323_v41 = vpop.f32.mrb[1].mxu0  ;;  %v3152_v46 = vadd.f32 %v321_v40, %v3709_v45  ;;  %v453_v40 = vld [vmem:[#allocation7 + $0x40] sm:$0xff] }
 0x12f   :  { %v3702_v42 = vadd.f32 %v323_v41, %v3699_v39  ;;  %v455_v41 = vld [vmem:[#allocation7 + $0x50] sm:$0xff] }
 0x130   :  { %v2672_v47 = vmul.f32 -1.442695, %v3152_v46  ;;  %v460_v46 = vld [vmem:[#allocation7 + $0x78] sm:$0xff] }
 0x131   :  { %3210 = vtanh.f32 %v3702_v42  ;;  %v2673_v58 = vmul.f32 -1.442695, %v3702_v42  ;;  %v234_v42 = vld [vmem:[%s4159_s6] sm:$0x3] }
 0x132   :  { %3212 = vpow2.f32 %v2672_v47  ;;  %v3756_v47 = vpack.c.bf16 %v455_v41, %v453_v40 }
 0x134   :  { %2799 = vmatpush1.bf16.msra.mxu1 %v3756_v47 }
 0x13b   :  { %v3211_v43 = vpop.eup %3210 }
 0x13c   :  { %430 = vrot.lane.b32.xlu0 %v3211_v43, %s3502_s24  ;;  %v3213_v48 = vpop.eup %3212  ;;  %v458_v43 = vld [vmem:[#allocation7 + $0x68] sm:$0xff] }
 0x13d   :  { %v421_v49 = vadd.f32 1.0, %v3213_v48  ;;  %v3759_v48 = vpack.c.bf16 %v460_v46, %v458_v43 }
 0x13f   :  { %3214 = vrcp.f32 %v421_v49  ;;  %v457_v49 = vld [vmem:[#allocation7 + $0x60] sm:$0xff]  ;;  %2801 = vmatprep.subr.bf16.mxu1 %v3759_v48 }
 0x149   :  { %v3712_v50 = vpop.eup %3214 }
 0x14a   :  { %v428_v53 = vmul.f32 0.0, %v3712_v50 }
 0x1ae   :  { %v431_v51 = vpop.permute.xlu0 %430 }
 0x1af   :  { %v433_v52 = vmul.f32 %v3712_v50, %v431_v51  ;;  %v459_v51 = vld [vmem:[#allocation7 + $0x70] sm:$0xff]  ;;  %v3798_v50 = vrot.slane %v234_v42, %v92_v37  ;;  %v3806_v37 = vrot.slane %v234_v42, %v88_v44 }
 0x1b1   :  { %435 = vrot.lane.b32.xlu0 %v433_v52, %s3502_s24  ;;  %v3762_v52 = vpack.c.bf16 %v459_v51, %v457_v49 }
 0x1b3   :  { %2803 = vmatpush1.bf16.msra.mxu1 %v3762_v52 }
 0x1b4   :  { %2821 = vmatprep.subr.bf16.mxu1 %v3716_v56 }
 0x223   :  { %v436_v54 = vpop.permute.xlu0 %435 }
 0x224   :  { %v3768_v55 = vadd.f32 %v436_v54, %v428_v53 }
 0x226   :  { %3216 = vtanh.f32 %v3768_v55 }
 0x227   :  { %3218 = vpow2.f32 %v2673_v58 }
 0x230   :  { %v3217_v57 = vpop.eup %3216 }
 0x231   :  { %441 = vrot.lane.b32.xlu1 %v3217_v57, %s3502_s24  ;;  %v3219_v59 = vpop.eup %3218 }
 0x232   :  { %v422_v62 = vadd.f32 1.0, %v3219_v59 }
 0x234   :  { %3220 = vrcp.f32 %v422_v62 }
 0x23e   :  { %v3221_v63 = vpop.eup %3220 }
 0x2a3   :  { %v442_v1 = vpop.permute.xlu1 %441 }
 0x2a4   :  { %v444_v2 = vmul.f32 %v3221_v63, %v442_v1 }
 0x2a6   :  { %2674 = vmatmul.mubr.msk.f32.vlgmr.msra.gmra.mrb[0].mxu1 %vm251_vm1, %v444_v2  ;;  %2677 = vmatmul.mubr.msk.f32.vlgmr.msra.gmra.mrb[2].mxu0 %vm251_vm1, %v444_v2 }
 0x2a7   :  { %2823 = vmatpush1.bf16.msra.mxu1 %v3718_v60  ;;  %2855 = vmatpush1.bf16.msra.mxu0 %v3622_v9 }
 0x2a8   :  { %2825 = vmatprep.subr.bf16.mxu1 %v3720_v61  ;;  %2857 = vmatprep.subr.bf16.mxu0 %v3629_v14 }
 0x2a9   :  { %716 = vmatprep.mubr.f32.mxu1 %v3501_v0  ;;  %925 = vmatprep.mubr.f32.mxu0 %v3501_v0 }
 0x2ab   :  { %2827 = vmatpush1.bf16.msra.mxu1 %v3724_v3  ;;  %2859 = vmatpush1.bf16.msra.mxu0 %v3632_v16 }
 0x2ac   :  { %2829 = vmatprep.subr.bf16.mxu1 %v3727_v4  ;;  %2861 = vmatprep.subr.bf16.mxu0 %v3635_v19 }
 0x2af   :  { %2831 = vmatpush1.bf16.msra.mxu1 %v3730_v11  ;;  %2863 = vmatpush1.bf16.msra.mxu0 %v3643_v25 }
 0x2b0   :  { %2833 = vmatprep.subr.bf16.mxu1 %v3733_v12  ;;  %2865 = vmatprep.subr.bf16.mxu0 %v3646_v26 }
 0x2b3   :  { %2835 = vmatpush1.bf16.msra.mxu1 %v3736_v20  ;;  %2867 = vmatpush1.bf16.msra.mxu0 %v3654_v30 }
 0x2b4   :  { %2837 = vmatprep.subr.bf16.mxu1 %v3739_v21  ;;  %2901 = vmatprep.subr.bf16.mxu0 %v3619_v7 }
 0x379   :  { %v530_v5 = vpop.f32.mrb[0].mxu1  ;;  %v644_v6 = vpop.f32.mrb[2].mxu0 }
 0x37a   :  { %v532_v8 = vpop.f32.mrb[1].mxu1  ;;  %v646_v10 = vpop.f32.mrb[3].mxu0  ;;  %v546_v22 = vadd.f32 %v3806_v37, %v530_v5  ;;  %v3154_v24 = vadd.f32 %v644_v6, %v3709_v45 }
 0x37b   :  { %v547_v13 = vadd.f32 %v3798_v50, %v532_v8  ;;  %v3155_v15 = vadd.f32 %v646_v10, %v3699_v39 }
 0x37c   :  { %v2675_v23 = vmul.f32 -1.442695, %v546_v22  ;;  %v2679_v27 = vmul.f32 -1.442695, %v3154_v24 }
 0x37d   :  { %3222 = vtanh.f32 %v547_v13  ;;  %v2676_v63 = vmul.f32 -1.442695, %v547_v13  ;;  %v2680_v1 = vmul.f32 -1.442695, %v3155_v15 }
 0x37e   :  { %3224 = vtanh.f32 %v3155_v15 }
 0x37f   :  { %3226 = vpow2.f32 %v2675_v23 }
 0x380   :  { %3228 = vpow2.f32 %v2679_v27 }
 0x387   :  { %v3223_v17 = vpop.eup %3222 }
 0x388   :  { %563 = vrot.lane.b32.xlu1 %v3223_v17, %s3502_s24  ;;  %v3225_v18 = vpop.eup %3224 }
 0x389   :  { %740 = vrot.lane.b32.xlu0 %v3225_v18, %s3502_s24  ;;  %v3227_v31 = vpop.eup %3226 }
 0x38a   :  { %v554_v32 = vadd.f32 1.0, %v3227_v31  ;;  %v3229_v33 = vpop.eup %3228 }
 0x38b   :  { %v731_v34 = vadd.f32 1.0, %v3229_v33 }
 0x38c   :  { %3230 = vrcp.f32 %v554_v32 }
 0x38d   :  { %3232 = vrcp.f32 %v731_v34 }
 0x396   :  { %v3231_v40 = vpop.eup %3230 }
 0x397   :  { %v3233_v36 = vpop.eup %3232  ;;  %v561_v49 = vmul.f32 0.0, %v3231_v40 }
 0x398   :  { %v738_v54 = vmul.f32 %v3233_v36, %v3768_v55 }
 0x3fa   :  { %v564_v41 = vpop.permute.xlu1 %563 }
 0x3fb   :  { %v566_v43 = vmul.f32 %v3231_v40, %v564_v41  ;;  %v741_v44 = vpop.permute.xlu0 %740 }
 0x3fc   :  { %v743_v46 = vmul.f32 %v3233_v36, %v741_v44 }
 0x3fd   :  { %568 = vrot.lane.b32.xlu1 %v566_v43, %s3502_s24 }
 0x3fe   :  { %745 = vrot.lane.b32.xlu0 %v743_v46, %s3502_s24 }
 0x46f   :  { %v569_v51 = vpop.permute.xlu1 %568 }
 0x470   :  { %v3812_v53 = vadd.f32 %v569_v51, %v561_v49  ;;  %v746_v57 = vpop.permute.xlu0 %745 }
 0x471   :  { %v3816_v58 = vadd.f32 %v746_v57, %v738_v54 }
 0x472   :  { %3234 = vtanh.f32 %v3812_v53 }
 0x473   :  { %3236 = vtanh.f32 %v3816_v58 }
 0x474   :  { %3238 = vpow2.f32 %v2676_v63 }
 0x475   :  { %3240 = vpow2.f32 %v2680_v1 }
 0x47c   :  { %v3235_v59 = vpop.eup %3234 }
 0x47d   :  { %574 = vrot.lane.b32.xlu1 %v3235_v59, %s3502_s24  ;;  %v3237_v62 = vpop.eup %3236 }
 0x47e   :  { %751 = vrot.lane.b32.xlu0 %v3237_v62, %s3502_s24  ;;  %v3239_v2 = vpop.eup %3238 }
 0x47f   :  { %v555_v42 = vadd.f32 1.0, %v3239_v2  ;;  %v3241_v5 = vpop.eup %3240 }
 0x480   :  { %v732_v55 = vadd.f32 1.0, %v3241_v5 }
 0x481   :  { %3242 = vrcp.f32 %v555_v42 }
 0x482   :  { %3244 = vrcp.f32 %v732_v55 }
 0x48b   :  { %v3243_v6 = vpop.eup %3242 }
 0x48c   :  { %v3245_v17 = vpop.eup %3244 }
 0x4ef   :  { %v575_v8 = vpop.permute.xlu1 %574 }
 0x4f0   :  { %v577_v10 = vmul.f32 %v3243_v6, %v575_v8  ;;  %v752_v13 = vpop.permute.xlu0 %751 }
 0x4f1   :  { %v754_v15 = vmul.f32 %v3245_v17, %v752_v13 }
 0x4f2   :  { %2678 = vmatmul.mubr.msk.f32.vlgmr.msra.gmra.mrb[2].mxu1 %vm251_vm1, %v577_v10 }
 0x4f3   :  { %2839 = vmatpush1.bf16.msra.mxu1 %v3742_v28  ;;  %822 = vmatprep.mubr.f32.mxu1 %v3501_v0 }
 0x4f4   :  { %2841 = vmatprep.subr.bf16.mxu1 %v3745_v29  ;;  %2684 = vmatmul.mubr.msk.f32.vlgmr.msra.gmra.mrb[4].mxu0 %vm251_vm1, %v754_v15 }
 0x4f5   :  { %2903 = vmatpush1.bf16.msra.mxu0 %v3622_v9  ;;  %1208 = vmatprep.mubr.f32.mxu0 %v3501_v0 }
 0x4f6   :  { %2905 = vmatprep.subr.bf16.mxu0 %v3629_v14 }
 0x4f7   :  { %2843 = vmatpush1.bf16.msra.mxu1 %v3749_v35 }
 0x4f8   :  { %2845 = vmatprep.subr.bf16.mxu1 %v3753_v38 }
 0x4f9   :  { %2907 = vmatpush1.bf16.msra.mxu0 %v3632_v16 }
 0x4fa   :  { %2909 = vmatprep.subr.bf16.mxu0 %v3635_v19 }
 0x4fb   :  { %2847 = vmatpush1.bf16.msra.mxu1 %v3756_v47 }
 0x4fc   :  { %2849 = vmatprep.subr.bf16.mxu1 %v3759_v48 }
 0x4fd   :  { %2911 = vmatpush1.bf16.msra.mxu0 %v3643_v25 }
 0x4fe   :  { %2913 = vmatprep.subr.bf16.mxu0 %v3646_v26 }
 0x4ff   :  { %2851 = vmatpush1.bf16.msra.mxu1 %v3762_v52 }
 0x500   :  { %2869 = vmatprep.subr.bf16.mxu1 %v3716_v56 }
 0x501   :  { %2915 = vmatpush1.bf16.msra.mxu0 %v3654_v30 }
 0x502   :  { %2681 = vmatmul.mubr.msk.f32.vlgmr.msra.gmra.mrb[2].mxu1 %vm251_vm1, %v754_v15  ;;  %2917 = vmatprep.subr.bf16.mxu0 %v3716_v56 }
 0x503   :  { %2871 = vmatpush1.bf16.msra.mxu1 %v3718_v60  ;;  %999 = vmatprep.mubr.f32.mxu1 %v3501_v0 }
 0x504   :  { %2873 = vmatprep.subr.bf16.mxu1 %v3720_v61 }
 0x507   :  { %2875 = vmatpush1.bf16.msra.mxu1 %v3724_v3 }
 0x508   :  { %2877 = vmatprep.subr.bf16.mxu1 %v3727_v4 }
 0x50b   :  { %2879 = vmatpush1.bf16.msra.mxu1 %v3730_v11 }
 0x50c   :  { %2881 = vmatprep.subr.bf16.mxu1 %v3733_v12 }
 0x50f   :  { %2883 = vmatpush1.bf16.msra.mxu1 %v3736_v20 }
 0x510   :  { %2885 = vmatprep.subr.bf16.mxu1 %v3739_v21 }
 0x5c7   :  { %v927_v18 = vpop.f32.mrb[4].mxu0 }
 0x5c8   :  { %v929_v22 = vpop.f32.mrb[5].mxu0  ;;  %v3156_v34 = vadd.f32 %v927_v18, %v3709_v45 }
 0x5c9   :  { %v3157_v23 = vadd.f32 %v929_v22, %v3699_v39 }
 0x5ca   :  { %v2686_v40 = vmul.f32 -1.442695, %v3156_v34 }
 0x5cb   :  { %3246 = vtanh.f32 %v3157_v23  ;;  %v2687_v17 = vmul.f32 -1.442695, %v3157_v23 }
 0x5d5   :  { %v824_v24 = vpop.f32.mrb[2].mxu1  ;;  %v3247_v32 = vpop.eup %3246 }
 0x5d6   :  { %v826_v27 = vpop.f32.mrb[3].mxu1  ;;  %1023 = vrot.lane.b32.xlu0 %v3247_v32, %s3502_s24  ;;  %v829_v41 = vadd.f32 %v824_v24, %v3806_v37 }
 0x5d7   :  { %v830_v31 = vadd.f32 %v826_v27, %v3798_v50 }
 0x5d8   :  { %v2682_v43 = vmul.f32 -1.442695, %v829_v41 }
 0x5d9   :  { %3248 = vtanh.f32 %v830_v31 }
 0x5da   :  { %3250 = vpow2.f32 %v2686_v40 }
 0x5db   :  { %3252 = vpow2.f32 %v2682_v43 }
 0x5e3   :  { %v3249_v33 = vpop.eup %3248 }
 0x5e4   :  { %846 = vrot.lane.b32.xlu1 %v3249_v33, %s3502_s24  ;;  %v3251_v36 = vpop.eup %3250 }
 0x5e5   :  { %v1014_v44 = vadd.f32 1.0, %v3251_v36  ;;  %v3253_v46 = vpop.eup %3252 }
 0x5e6   :  { %v837_v49 = vadd.f32 1.0, %v3253_v46 }
 0x5e7   :  { %3254 = vrcp.f32 %v1014_v44 }
 0x5e8   :  { %3256 = vrcp.f32 %v837_v49 }
 0x5f1   :  { %v3255_v51 = vpop.eup %3254 }
 0x5f2   :  { %v3257_v59 = vpop.eup %3256  ;;  %v1021_v1 = vmul.f32 %v3255_v51, %v3816_v58  ;;  %v2683_v58 = vmul.f32 -1.442695, %v830_v31 }
 0x5f3   :  { %v844_v5 = vmul.f32 %v3257_v59, %v3812_v53 }
 0x648   :  { %v1024_v54 = vpop.permute.xlu0 %1023 }
 0x649   :  { %v1026_v57 = vmul.f32 %v3255_v51, %v1024_v54 }
 0x64b   :  { %1028 = vrot.lane.b32.xlu0 %v1026_v57, %s3502_s24 }
 0x656   :  { %v847_v62 = vpop.permute.xlu1 %846 }
 0x657   :  { %v849_v63 = vmul.f32 %v3257_v59, %v847_v62 }
 0x659   :  { %851 = vrot.lane.b32.xlu1 %v849_v63, %s3502_s24 }
 0x6bd   :  { %v1029_v2 = vpop.permute.xlu0 %1028 }
 0x6be   :  { %v3860_v42 = vadd.f32 %v1029_v2, %v1021_v1 }
 0x6c0   :  { %3258 = vtanh.f32 %v3860_v42 }
 0x6ca   :  { %v3259_v8 = vpop.eup %3258 }
 0x6cb   :  { %v852_v55 = vpop.permute.xlu1 %851  ;;  %1034 = vrot.lane.b32.xlu0 %v3259_v8, %s3502_s24 }
 0x6cc   :  { %v3864_v6 = vadd.f32 %v852_v55, %v844_v5 }
 0x6ce   :  { %3260 = vtanh.f32 %v3864_v6 }
 0x6cf   :  { %3262 = vpow2.f32 %v2687_v17 }
 0x6d0   :  { %3264 = vpow2.f32 %v2683_v58 }
 0x6d8   :  { %v3261_v10 = vpop.eup %3260 }
 0x6d9   :  { %857 = vrot.lane.b32.xlu1 %v3261_v10, %s3502_s24  ;;  %v3263_v13 = vpop.eup %3262 }
 0x6da   :  { %v1015_v15 = vadd.f32 1.0, %v3263_v13  ;;  %v3265_v18 = vpop.eup %3264 }
 0x6db   :  { %v838_v53 = vadd.f32 1.0, %v3265_v18 }
 0x6dc   :  { %3266 = vrcp.f32 %v1015_v15 }
 0x6dd   :  { %3268 = vrcp.f32 %v838_v53 }
 0x6e6   :  { %v3267_v22 = vpop.eup %3266 }
 0x6e7   :  { %v3269_v23 = vpop.eup %3268 }
 0x73d   :  { %v1035_v24 = vpop.permute.xlu0 %1034 }
 0x73e   :  { %v1037_v27 = vmul.f32 %v3267_v22, %v1035_v24 }
 0x740   :  { %2691 = vmatmul.mubr.msk.f32.vlgmr.msra.gmra.mrb[6].mxu0 %vm251_vm1, %v1037_v27 }
 0x741   :  { %2919 = vmatpush1.bf16.msra.mxu0 %v3718_v60  ;;  %1282 = vmatprep.mubr.f32.mxu0 %v3501_v0 }
 0x742   :  { %2921 = vmatprep.subr.bf16.mxu0 %v3720_v61 }
 0x745   :  { %2923 = vmatpush1.bf16.msra.mxu0 %v3724_v3 }
 0x746   :  { %2925 = vmatprep.subr.bf16.mxu0 %v3727_v4 }
 0x749   :  { %2927 = vmatpush1.bf16.msra.mxu0 %v3730_v11 }
 0x74a   :  { %2929 = vmatprep.subr.bf16.mxu0 %v3733_v12 }
 0x74b   :  { %v858_v31 = vpop.permute.xlu1 %857 }
 0x74c   :  { %v860_v32 = vmul.f32 %v3269_v23, %v858_v31 }
 0x74d   :  { %2931 = vmatpush1.bf16.msra.mxu0 %v3736_v20 }
 0x74e   :  { %2685 = vmatmul.mubr.msk.f32.vlgmr.msra.gmra.mrb[4].mxu1 %vm251_vm1, %v860_v32  ;;  %2933 = vmatprep.subr.bf16.mxu0 %v3739_v21 }
 0x74f   :  { %2887 = vmatpush1.bf16.msra.mxu1 %v3742_v28  ;;  %1105 = vmatprep.mubr.f32.mxu1 %v3501_v0 }
 0x750   :  { %2889 = vmatprep.subr.bf16.mxu1 %v3745_v29 }
 0x753   :  { %2891 = vmatpush1.bf16.msra.mxu1 %v3749_v35 }
 0x754   :  { %2893 = vmatprep.subr.bf16.mxu1 %v3753_v38 }
 0x757   :  { %2895 = vmatpush1.bf16.msra.mxu1 %v3756_v47 }
 0x758   :  { %2897 = vmatprep.subr.bf16.mxu1 %v3759_v48 }
 0x75b   :  { %2899 = vmatpush1.bf16.msra.mxu1 %v3762_v52 }
 0x75c   :  { %2965 = vmatprep.subr.bf16.mxu1 %v3716_v56 }
 0x75e   :  { %2688 = vmatmul.mubr.msk.f32.vlgmr.msra.gmra.mrb[4].mxu1 %vm251_vm1, %v1037_v27 }
 0x75f   :  { %2967 = vmatpush1.bf16.msra.mxu1 %v3718_v60  ;;  %1565 = vmatprep.mubr.f32.mxu1 %v3501_v0 }
 0x760   :  { %2969 = vmatprep.subr.bf16.mxu1 %v3720_v61 }
 0x763   :  { %2971 = vmatpush1.bf16.msra.mxu1 %v3724_v3 }
 0x764   :  { %2973 = vmatprep.subr.bf16.mxu1 %v3727_v4 }
 0x767   :  { %2975 = vmatpush1.bf16.msra.mxu1 %v3730_v11 }
 0x768   :  { %2977 = vmatprep.subr.bf16.mxu1 %v3733_v12 }
 0x76b   :  { %2979 = vmatpush1.bf16.msra.mxu1 %v3736_v20 }
 0x76c   :  { %2981 = vmatprep.subr.bf16.mxu1 %v3739_v21 }
 0x813   :  { %v1210_v33 = vpop.f32.mrb[6].mxu0 }
 0x814   :  { %v1212_v34 = vpop.f32.mrb[7].mxu0  ;;  %v3158_v49 = vadd.f32 %v1210_v33, %v3709_v45 }
 0x815   :  { %v3159_v40 = vadd.f32 %v1212_v34, %v3699_v39 }
 0x816   :  { %v2693_v51 = vmul.f32 -1.442695, %v3158_v49 }
 0x817   :  { %3270 = vtanh.f32 %v3159_v40  ;;  %v2694_v31 = vmul.f32 -1.442695, %v3159_v40 }
 0x821   :  { %v3271_v41 = vpop.eup %3270 }
 0x822   :  { %1306 = vrot.lane.b32.xlu0 %v3271_v41, %s3502_s24 }
 0x831   :  { %v1107_v43 = vpop.f32.mrb[4].mxu1 }
 0x832   :  { %v1109_v36 = vpop.f32.mrb[5].mxu1  ;;  %v1112_v59 = vadd.f32 %v1107_v43, %v3806_v37 }
 0x833   :  { %v1113_v44 = vadd.f32 %v1109_v36, %v3798_v50 }
 0x834   :  { %v2689_v62 = vmul.f32 -1.442695, %v1112_v59 }
 0x835   :  { %3272 = vtanh.f32 %v1113_v44  ;;  %v2690_v23 = vmul.f32 -1.442695, %v1113_v44 }
 0x836   :  { %3274 = vpow2.f32 %v2693_v51 }
 0x83f   :  { %v3273_v46 = vpop.eup %3272 }
 0x840   :  { %1129 = vrot.lane.b32.xlu1 %v3273_v46, %s3502_s24  ;;  %v3275_v54 = vpop.eup %3274 }
 0x841   :  { %v1297_v57 = vadd.f32 1.0, %v3275_v54 }
 0x843   :  { %3276 = vrcp.f32 %v1297_v57 }
 0x844   :  { %3278 = vpow2.f32 %v2689_v62 }
 0x84d   :  { %v3277_v63 = vpop.eup %3276 }
 0x84e   :  { %v3279_v5 = vpop.eup %3278  ;;  %v1304_v58 = vmul.f32 %v3277_v63, %v3860_v42 }
 0x84f   :  { %v1120_v55 = vadd.f32 1.0, %v3279_v5 }
 0x851   :  { %3280 = vrcp.f32 %v1120_v55 }
 0x85b   :  { %v3281_v8 = vpop.eup %3280 }
 0x85c   :  { %v1127_v53 = vmul.f32 %v3281_v8, %v3864_v6 }
 0x894   :  { %v1307_v1 = vpop.permute.xlu0 %1306 }
 0x895   :  { %v1309_v2 = vmul.f32 %v3277_v63, %v1307_v1 }
 0x897   :  { %1311 = vrot.lane.b32.xlu0 %v1309_v2, %s3502_s24 }
 0x8b2   :  { %v1130_v10 = vpop.permute.xlu1 %1129 }
 0x8b3   :  { %v1132_v17 = vmul.f32 %v3281_v8, %v1130_v10 }
 0x8b5   :  { %1134 = vrot.lane.b32.xlu1 %v1132_v17, %s3502_s24 }
 0x909   :  { %v1312_v13 = vpop.permute.xlu0 %1311 }
 0x90a   :  { %v3908_v15 = vadd.f32 %v1312_v13, %v1304_v58 }
 0x90c   :  { %3282 = vtanh.f32 %v3908_v15 }
 0x916   :  { %v3283_v18 = vpop.eup %3282 }
 0x917   :  { %1317 = vrot.lane.b32.xlu0 %v3283_v18, %s3502_s24 }
 0x927   :  { %v1135_v22 = vpop.permute.xlu1 %1134 }
 0x928   :  { %v3913_v24 = vadd.f32 %v1135_v22, %v1127_v53 }
 0x92a   :  { %3284 = vtanh.f32 %v3913_v24 }
 0x92b   :  { %3286 = vpow2.f32 %v2690_v23 }
 0x92c   :  { %3288 = vpow2.f32 %v2694_v31 }
 0x934   :  { %v3285_v27 = vpop.eup %3284 }
 0x935   :  { %1140 = vrot.lane.b32.xlu1 %v3285_v27, %s3502_s24  ;;  %v3287_v42 = vpop.eup %3286 }
 0x936   :  { %v1121_v32 = vadd.f32 1.0, %v3287_v42  ;;  %v3289_v33 = vpop.eup %3288 }
 0x937   :  { %v1298_v6 = vadd.f32 1.0, %v3289_v33 }
 0x938   :  { %3290 = vrcp.f32 %v1121_v32 }
 0x939   :  { %3292 = vrcp.f32 %v1298_v6 }
 0x942   :  { %v3291_v34 = vpop.eup %3290 }
 0x943   :  { %v3293_v36 = vpop.eup %3292 }
 0x989   :  { %v1318_v40 = vpop.permute.xlu0 %1317 }
 0x98a   :  { %v1320_v44 = vmul.f32 %v3293_v36, %v1318_v40 }
 0x9a7   :  { %v1141_v41 = vpop.permute.xlu1 %1140 }
 0x9a8   :  { %v1143_v43 = vmul.f32 %v3291_v34, %v1141_v41 }
 0x9aa   :  { %2692 = vmatmul.mubr.msk.f32.vlgmr.msra.gmra.mrb[16].mxu0 %vm251_vm1, %v1143_v43 }
 0x9ab   :  { %2935 = vmatpush1.bf16.msra.mxu0 %v3742_v28  ;;  %1388 = vmatprep.mubr.f32.mxu0 %v3501_v0 }
 0x9ac   :  { %2937 = vmatprep.subr.bf16.mxu0 %v3745_v29 }
 0x9af   :  { %2939 = vmatpush1.bf16.msra.mxu0 %v3749_v35 }
 0x9b0   :  { %2941 = vmatprep.subr.bf16.mxu0 %v3753_v38 }
 0x9b3   :  { %2943 = vmatpush1.bf16.msra.mxu0 %v3756_v47 }
 0x9b4   :  { %2945 = vmatprep.subr.bf16.mxu0 %v3759_v48 }
 0x9b7   :  { %2947 = vmatpush1.bf16.msra.mxu0 %v3762_v52 }
 0x9b8   :  { %2949 = vmatprep.subr.bf16.mxu0 %v3619_v7 }
 0x9ba   :  { %2695 = vmatmul.mubr.msk.f32.vlgmr.msra.gmra.mrb[16].mxu0 %vm251_vm1, %v1320_v44 }
 0x9bb   :  { %2951 = vmatpush1.bf16.msra.mxu0 %v3622_v9  ;;  %1491 = vmatprep.mubr.f32.mxu0 %v3501_v0 }
 0x9bc   :  { %2953 = vmatprep.subr.bf16.mxu0 %v3629_v14 }
 0x9bf   :  { %2955 = vmatpush1.bf16.msra.mxu0 %v3632_v16 }
 0x9c0   :  { %2957 = vmatprep.subr.bf16.mxu0 %v3635_v19 }
 0x9c3   :  { %2959 = vmatpush1.bf16.msra.mxu0 %v3643_v25 }
 0x9c4   :  { %2961 = vmatprep.subr.bf16.mxu0 %v3646_v26 }
 0x9c7   :  { %2963 = vmatpush1.bf16.msra.mxu0 %v3654_v30 }
 0x9c8   :  { %2997 = vmatprep.subr.bf16.mxu0 %v3619_v7 }
 0x9ca   :  { %2698 = vmatmul.mubr.msk.f32.vlgmr.msra.gmra.mrb[8].mxu0 %vm251_vm1, %v1320_v44 }
 0x9cb   :  { %2999 = vmatpush1.bf16.msra.mxu0 %v3622_v9  ;;  %1774 = vmatprep.mubr.f32.mxu0 %v3501_v0 }
 0x9cc   :  { %3001 = vmatprep.subr.bf16.mxu0 %v3629_v14 }
 0x9cf   :  { %3003 = vmatpush1.bf16.msra.mxu0 %v3632_v16 }
 0x9d0   :  { %3005 = vmatprep.subr.bf16.mxu0 %v3635_v19 }
 0x9d3   :  { %3007 = vmatpush1.bf16.msra.mxu0 %v3643_v25 }
 0x9d4   :  { %3009 = vmatprep.subr.bf16.mxu0 %v3646_v26 }
 0x9d7   :  { %3011 = vmatpush1.bf16.msra.mxu0 %v3654_v30 }
 0x9d8   :  { %3045 = vmatprep.subr.bf16.mxu0 %v3619_v7 }
 0xa8d   :  { %v1390_v46 = vpop.f32.mrb[16].mxu0 }
 0xa8e   :  { %v1392_v49 = vpop.f32.mrb[17].mxu0  ;;  %v1395_v1 = vadd.f32 %v1390_v46, %v3806_v37 }
 0xa8f   :  { %v1396_v51 = vadd.f32 %v1392_v49, %v3798_v50 }
 0xa90   :  { %v2696_v2 = vmul.f32 -1.442695, %v1395_v1 }
 0xa91   :  { %3294 = vtanh.f32 %v1396_v51  ;;  %v2697_v40 = vmul.f32 -1.442695, %v1396_v51 }
 0xa9b   :  { %v3295_v54 = vpop.eup %3294 }
 0xa9c   :  { %1412 = vrot.lane.b32.xlu1 %v3295_v54, %s3502_s24 }
 0xa9d   :  { %v1493_v57 = vpop.f32.mrb[8].mxu0 }
 0xa9e   :  { %v1495_v59 = vpop.f32.mrb[9].mxu0  ;;  %v3160_v5 = vadd.f32 %v1493_v57, %v3709_v45 }
 0xa9f   :  { %v3161_v62 = vadd.f32 %v1495_v59, %v3699_v39 }
 0xaa0   :  { %v2700_v8 = vmul.f32 -1.442695, %v3160_v5 }
 0xaa1   :  { %3296 = vtanh.f32 %v3161_v62  ;;  %v2701_v36 = vmul.f32 -1.442695, %v3161_v62 }
 0xaa2   :  { %3298 = vpow2.f32 %v2696_v2 }
 0xaa3   :  { %3300 = vpow2.f32 %v2700_v8 }
 0xaab   :  { %v3297_v63 = vpop.eup %3296 }
 0xaac   :  { %1589 = vrot.lane.b32.xlu0 %v3297_v63, %s3502_s24  ;;  %v3299_v55 = vpop.eup %3298 }
 0xaad   :  { %v1403_v10 = vadd.f32 1.0, %v3299_v55  ;;  %v3301_v17 = vpop.eup %3300 }
 0xaae   :  { %v1580_v53 = vadd.f32 1.0, %v3301_v17 }
 0xaaf   :  { %3302 = vrcp.f32 %v1403_v10 }
 0xab0   :  { %3304 = vrcp.f32 %v1580_v53 }
 0xab9   :  { %v3303_v58 = vpop.eup %3302 }
 0xaba   :  { %v3305_v22 = vpop.eup %3304  ;;  %v1410_v42 = vmul.f32 %v3303_v58, %v3913_v24 }
 0xabb   :  { %v1587_v34 = vmul.f32 %v3305_v22, %v3908_v15 }
 0xb0e   :  { %v1413_v13 = vpop.permute.xlu1 %1412 }
 0xb0f   :  { %v1415_v18 = vmul.f32 %v3303_v58, %v1413_v13 }
 0xb11   :  { %1417 = vrot.lane.b32.xlu1 %v1415_v18, %s3502_s24 }
 0xb1e   :  { %v1590_v27 = vpop.permute.xlu0 %1589 }
 0xb1f   :  { %v1592_v23 = vmul.f32 %v3305_v22, %v1590_v27 }
 0xb21   :  { %1594 = vrot.lane.b32.xlu0 %v1592_v23, %s3502_s24 }
 0xb83   :  { %v1418_v31 = vpop.permute.xlu1 %1417 }
 0xb84   :  { %v3956_v32 = vadd.f32 %v1418_v31, %v1410_v42 }
 0xb86   :  { %3306 = vtanh.f32 %v3956_v32 }
 0xb90   :  { %v3307_v33 = vpop.eup %3306 }
 0xb91   :  { %1423 = vrot.lane.b32.xlu1 %v3307_v33, %s3502_s24 }
 0xb93   :  { %v1595_v41 = vpop.permute.xlu0 %1594 }
 0xb94   :  { %v3961_v43 = vadd.f32 %v1595_v41, %v1587_v34 }
 0xb96   :  { %3308 = vtanh.f32 %v3961_v43 }
 0xb97   :  { %3310 = vpow2.f32 %v2697_v40 }
 0xb98   :  { %3312 = vpow2.f32 %v2701_v36 }
 0xba0   :  { %v3309_v6 = vpop.eup %3308 }
 0xba1   :  { %1600 = vrot.lane.b32.xlu0 %v3309_v6, %s3502_s24  ;;  %v3311_v24 = vpop.eup %3310 }
 0xba2   :  { %v1404_v44 = vadd.f32 1.0, %v3311_v24  ;;  %v3313_v46 = vpop.eup %3312 }
 0xba3   :  { %v1581_v15 = vadd.f32 1.0, %v3313_v46 }
 0xba4   :  { %3314 = vrcp.f32 %v1404_v44 }
 0xba5   :  { %3316 = vrcp.f32 %v1581_v15 }
 0xbae   :  { %v3315_v49 = vpop.eup %3314 }
 0xbaf   :  { %v3317_v51 = vpop.eup %3316 }
 0xc03   :  { %v1424_v54 = vpop.permute.xlu1 %1423 }
 0xc04   :  { %v1426_v57 = vmul.f32 %v3315_v49, %v1424_v54 }
 0xc06   :  { %2699 = vmatmul.mubr.msk.f32.vlgmr.msra.gmra.mrb[6].mxu1 %vm251_vm1, %v1426_v57 }
 0xc07   :  { %2983 = vmatpush1.bf16.msra.mxu1 %v3742_v28  ;;  %1671 = vmatprep.mubr.f32.mxu1 %v3501_v0 }
 0xc08   :  { %2985 = vmatprep.subr.bf16.mxu1 %v3745_v29 }
 0xc0b   :  { %2987 = vmatpush1.bf16.msra.mxu1 %v3749_v35 }
 0xc0c   :  { %2989 = vmatprep.subr.bf16.mxu1 %v3753_v38 }
 0xc0f   :  { %2991 = vmatpush1.bf16.msra.mxu1 %v3756_v47 }
 0xc10   :  { %2993 = vmatprep.subr.bf16.mxu1 %v3759_v48 }
 0xc13   :  { %v1601_v59 = vpop.permute.xlu0 %1600  ;;  %2995 = vmatpush1.bf16.msra.mxu1 %v3762_v52 }
 0xc14   :  { %v1603_v62 = vmul.f32 %v3317_v51, %v1601_v59  ;;  %3013 = vmatprep.subr.bf16.mxu1 %v3716_v56 }
 0xc16   :  { %2702 = vmatmul.mubr.msk.f32.vlgmr.msra.gmra.mrb[6].mxu1 %vm251_vm1, %v1603_v62  ;;  %2705 = vmatmul.mubr.msk.f32.vlgmr.msra.gmra.mrb[10].mxu0 %vm251_vm1, %v1603_v62 }
 0xc17   :  { %3015 = vmatpush1.bf16.msra.mxu1 %v3718_v60  ;;  %3047 = vmatpush1.bf16.msra.mxu0 %v3622_v9 }
 0xc18   :  { %3017 = vmatprep.subr.bf16.mxu1 %v3720_v61  ;;  %3049 = vmatprep.subr.bf16.mxu0 %v3629_v14 }
 0xc19   :  { %1848 = vmatprep.mubr.f32.mxu1 %v3501_v0  ;;  %2057 = vmatprep.mubr.f32.mxu0 %v3501_v0 }
 0xc1b   :  { %3019 = vmatpush1.bf16.msra.mxu1 %v3724_v3  ;;  %3051 = vmatpush1.bf16.msra.mxu0 %v3632_v16 }
 0xc1c   :  { %3021 = vmatprep.subr.bf16.mxu1 %v3727_v4  ;;  %3053 = vmatprep.subr.bf16.mxu0 %v3635_v19 }
 0xc1f   :  { %3023 = vmatpush1.bf16.msra.mxu1 %v3730_v11  ;;  %3055 = vmatpush1.bf16.msra.mxu0 %v3643_v25 }
 0xc20   :  { %3025 = vmatprep.subr.bf16.mxu1 %v3733_v12  ;;  %3057 = vmatprep.subr.bf16.mxu0 %v3646_v26 }
 0xc23   :  { %3027 = vmatpush1.bf16.msra.mxu1 %v3736_v20  ;;  %3059 = vmatpush1.bf16.msra.mxu0 %v3654_v30 }
 0xc24   :  { %3029 = vmatprep.subr.bf16.mxu1 %v3739_v21  ;;  %3093 = vmatprep.subr.bf16.mxu0 %v3619_v7 }
 0xce9   :  { %v1673_v63 = vpop.f32.mrb[6].mxu1  ;;  %v1776_v1 = vpop.f32.mrb[10].mxu0 }
 0xcea   :  { %v1675_v2 = vpop.f32.mrb[7].mxu1  ;;  %v1778_v5 = vpop.f32.mrb[11].mxu0  ;;  %v1678_v58 = vadd.f32 %v1673_v63, %v3806_v37  ;;  %v3162_v7 = vadd.f32 %v1776_v1, %v3709_v45 }
 0xceb   :  { %v1679_v55 = vadd.f32 %v1675_v2, %v3798_v50  ;;  %v3163_v8 = vadd.f32 %v1778_v5, %v3699_v39 }
 0xcec   :  { %v2703_v13 = vmul.f32 -1.442695, %v1678_v58  ;;  %v2707_v18 = vmul.f32 -1.442695, %v3162_v7 }
 0xced   :  { %3318 = vtanh.f32 %v1679_v55  ;;  %v2704_v15 = vmul.f32 -1.442695, %v1679_v55 }
 0xcee   :  { %3320 = vtanh.f32 %v3163_v8 }
 0xcef   :  { %3322 = vpow2.f32 %v2703_v13 }
 0xcf0   :  { %3324 = vpow2.f32 %v2707_v18 }
 0xcf7   :  { %v3319_v10 = vpop.eup %3318 }
 0xcf8   :  { %1695 = vrot.lane.b32.xlu1 %v3319_v10, %s3502_s24  ;;  %v3321_v17 = vpop.eup %3320 }
 0xcf9   :  { %1872 = vrot.lane.b32.xlu0 %v3321_v17, %s3502_s24  ;;  %v3323_v53 = vpop.eup %3322 }
 0xcfa   :  { %v1686_v22 = vadd.f32 1.0, %v3323_v53  ;;  %v3325_v27 = vpop.eup %3324 }
 0xcfb   :  { %v1863_v23 = vadd.f32 1.0, %v3325_v27 }
 0xcfc   :  { %3326 = vrcp.f32 %v1686_v22 }
 0xcfd   :  { %3328 = vrcp.f32 %v1863_v23 }
 0xd06   :  { %v3327_v42 = vpop.eup %3326 }
 0xd07   :  { %v3329_v34 = vpop.eup %3328  ;;  %v1693_v40 = vmul.f32 %v3327_v42, %v3956_v32  ;;  %v2708_v32 = vmul.f32 -1.442695, %v3163_v8 }
 0xd08   :  { %v1870_v44 = vmul.f32 %v3329_v34, %v3961_v43 }
 0xd6a   :  { %v1696_v31 = vpop.permute.xlu1 %1695 }
 0xd6b   :  { %v1698_v33 = vmul.f32 %v3327_v42, %v1696_v31  ;;  %v1873_v41 = vpop.permute.xlu0 %1872 }
 0xd6c   :  { %v1875_v6 = vmul.f32 %v3329_v34, %v1873_v41 }
 0xd6d   :  { %1700 = vrot.lane.b32.xlu1 %v1698_v33, %s3502_s24 }
 0xd6e   :  { %1877 = vrot.lane.b32.xlu0 %v1875_v6, %s3502_s24 }
 0xddf   :  { %v1701_v24 = vpop.permute.xlu1 %1700 }
 0xde0   :  { %v4004_v36 = vadd.f32 %v1701_v24, %v1693_v40  ;;  %v1878_v46 = vpop.permute.xlu0 %1877 }
 0xde1   :  { %v4008_v49 = vadd.f32 %v1878_v46, %v1870_v44 }
 0xde2   :  { %3330 = vtanh.f32 %v4004_v36 }
 0xde3   :  { %3332 = vtanh.f32 %v4008_v49 }
 0xde4   :  { %3334 = vpow2.f32 %v2704_v15 }
 0xde5   :  { %3336 = vpow2.f32 %v2708_v32 }
 0xdec   :  { %v3331_v54 = vpop.eup %3330 }
 0xded   :  { %1706 = vrot.lane.b32.xlu1 %v3331_v54, %s3502_s24  ;;  %v3333_v57 = vpop.eup %3332 }
 0xdee   :  { %1883 = vrot.lane.b32.xlu0 %v3333_v57, %s3502_s24  ;;  %v3335_v51 = vpop.eup %3334 }
 0xdef   :  { %v1687_v59 = vadd.f32 1.0, %v3335_v51  ;;  %v3337_v62 = vpop.eup %3336 }
 0xdf0   :  { %v1864_v43 = vadd.f32 1.0, %v3337_v62 }
 0xdf1   :  { %3338 = vrcp.f32 %v1687_v59 }
 0xdf2   :  { %3340 = vrcp.f32 %v1864_v43 }
 0xdfb   :  { %v3339_v63 = vpop.eup %3338 }
 0xdfc   :  { %v3341_v5 = vpop.eup %3340 }
 0xe5f   :  { %v1707_v1 = vpop.permute.xlu1 %1706 }
 0xe60   :  { %v1709_v2 = vmul.f32 %v3339_v63, %v1707_v1  ;;  %v1884_v55 = vpop.permute.xlu0 %1883 }
 0xe61   :  { %v1886_v8 = vmul.f32 %v3341_v5, %v1884_v55 }
 0xe62   :  { %2706 = vmatmul.mubr.msk.f32.vlgmr.msra.gmra.mrb[8].mxu1 %vm251_vm1, %v1709_v2 }
 0xe63   :  { %3031 = vmatpush1.bf16.msra.mxu1 %v3742_v28  ;;  %1954 = vmatprep.mubr.f32.mxu1 %v3501_v0 }
 0xe64   :  { %3033 = vmatprep.subr.bf16.mxu1 %v3745_v29  ;;  %2712 = vmatmul.mubr.msk.f32.vlgmr.msra.gmra.mrb[12].mxu0 %vm251_vm1, %v1886_v8 }
 0xe65   :  { %3095 = vmatpush1.bf16.msra.mxu0 %v3622_v9  ;;  %2340 = vmatprep.mubr.f32.mxu0 %v3501_v0 }
 0xe66   :  { %3097 = vmatprep.subr.bf16.mxu0 %v3629_v14 }
 0xe67   :  { %3035 = vmatpush1.bf16.msra.mxu1 %v3749_v35 }
 0xe68   :  { %3037 = vmatprep.subr.bf16.mxu1 %v3753_v38 }
 0xe69   :  { %3099 = vmatpush1.bf16.msra.mxu0 %v3632_v16 }
 0xe6a   :  { %3101 = vmatprep.subr.bf16.mxu0 %v3635_v19 }
 0xe6b   :  { %3039 = vmatpush1.bf16.msra.mxu1 %v3756_v47 }
 0xe6c   :  { %3041 = vmatprep.subr.bf16.mxu1 %v3759_v48 }
 0xe6d   :  { %3103 = vmatpush1.bf16.msra.mxu0 %v3643_v25 }
 0xe6e   :  { %3105 = vmatprep.subr.bf16.mxu0 %v3646_v26 }
 0xe6f   :  { %3043 = vmatpush1.bf16.msra.mxu1 %v3762_v52 }
 0xe70   :  { %3061 = vmatprep.subr.bf16.mxu1 %v3716_v56 }
 0xe71   :  { %3107 = vmatpush1.bf16.msra.mxu0 %v3654_v30 }
 0xe72   :  { %2709 = vmatmul.mubr.msk.f32.vlgmr.msra.gmra.mrb[8].mxu1 %vm251_vm1, %v1886_v8  ;;  %3109 = vmatprep.subr.bf16.mxu0 %v3716_v56 }
 0xe73   :  { %3063 = vmatpush1.bf16.msra.mxu1 %v3718_v60  ;;  %2131 = vmatprep.mubr.f32.mxu1 %v3501_v0 }
 0xe74   :  { %3065 = vmatprep.subr.bf16.mxu1 %v3720_v61 }
 0xe77   :  { %3067 = vmatpush1.bf16.msra.mxu1 %v3724_v3 }
 0xe78   :  { %3069 = vmatprep.subr.bf16.mxu1 %v3727_v4 }
 0xe7b   :  { %3071 = vmatpush1.bf16.msra.mxu1 %v3730_v11 }
 0xe7c   :  { %3073 = vmatprep.subr.bf16.mxu1 %v3733_v12 }
 0xe7f   :  { %3075 = vmatpush1.bf16.msra.mxu1 %v3736_v20 }
 0xe80   :  { %3077 = vmatprep.subr.bf16.mxu1 %v3739_v21 }
 0xf37   :  { %v2059_v9 = vpop.f32.mrb[12].mxu0 }
 0xf38   :  { %v2061_v14 = vpop.f32.mrb[13].mxu0  ;;  %v3164_v10 = vadd.f32 %v2059_v9, %v3709_v45 }
 0xf39   :  { %v3165_v16 = vadd.f32 %v2061_v14, %v3699_v39 }
 0xf3a   :  { %v2714_v17 = vmul.f32 -1.442695, %v3164_v10 }
 0xf3b   :  { %3342 = vtanh.f32 %v3165_v16  ;;  %v2715_v15 = vmul.f32 -1.442695, %v3165_v16 }
 0xf45   :  { %v1956_v19 = vpop.f32.mrb[8].mxu1  ;;  %v3343_v30 = vpop.eup %3342 }
 0xf46   :  { %v1958_v25 = vpop.f32.mrb[9].mxu1  ;;  %2155 = vrot.lane.b32.xlu0 %v3343_v30, %s3502_s24  ;;  %v1961_v58 = vadd.f32 %v1956_v19, %v3806_v37 }
 0xf47   :  { %v1962_v26 = vadd.f32 %v1958_v25, %v3798_v50 }
 0xf48   :  { %v2710_v13 = vmul.f32 -1.442695, %v1961_v58 }
 0xf49   :  { %3344 = vtanh.f32 %v1962_v26 }
 0xf4a   :  { %3346 = vpow2.f32 %v2714_v17 }
 0xf4b   :  { %3348 = vpow2.f32 %v2710_v13 }
 0xf53   :  { %v3345_v56 = vpop.eup %3344 }
 0xf54   :  { %1978 = vrot.lane.b32.xlu1 %v3345_v56, %s3502_s24  ;;  %v3347_v7 = vpop.eup %3346 }
 0xf55   :  { %v2146_v18 = vadd.f32 1.0, %v3347_v7  ;;  %v3349_v53 = vpop.eup %3348 }
 0xf56   :  { %v1969_v22 = vadd.f32 1.0, %v3349_v53 }
 0xf57   :  { %3350 = vrcp.f32 %v2146_v18 }
 0xf58   :  { %3352 = vrcp.f32 %v1969_v22 }
 0xf61   :  { %v3351_v27 = vpop.eup %3350 }
 0xf62   :  { %v3353_v31 = vpop.eup %3352  ;;  %v2153_v41 = vmul.f32 %v3351_v27, %v4008_v49  ;;  %v2711_v49 = vmul.f32 -1.442695, %v1962_v26 }
 0xf63   :  { %v1976_v24 = vmul.f32 %v3353_v31, %v4004_v36 }
 0xfb8   :  { %v2156_v23 = vpop.permute.xlu0 %2155 }
 0xfb9   :  { %v2158_v42 = vmul.f32 %v3351_v27, %v2156_v23 }
 0xfbb   :  { %2160 = vrot.lane.b32.xlu0 %v2158_v42, %s3502_s24 }
 0xfc6   :  { %v1979_v33 = vpop.permute.xlu1 %1978 }
 0xfc7   :  { %v1981_v34 = vmul.f32 %v3353_v31, %v1979_v33 }
 0xfc9   :  { %1983 = vrot.lane.b32.xlu1 %v1981_v34, %s3502_s24 }
0x102d   :  { %v2161_v6 = vpop.permute.xlu0 %2160 }
0x102e   :  { %v4052_v40 = vadd.f32 %v2161_v6, %v2153_v41 }
0x1030   :  { %3354 = vtanh.f32 %v4052_v40 }
0x103a   :  { %v3355_v54 = vpop.eup %3354 }
0x103b   :  { %v1984_v44 = vpop.permute.xlu1 %1983  ;;  %2166 = vrot.lane.b32.xlu0 %v3355_v54, %s3502_s24 }
0x103c   :  { %v4056_v46 = vadd.f32 %v1984_v44, %v1976_v24 }
0x103e   :  { %3356 = vtanh.f32 %v4056_v46 }
0x103f   :  { %3358 = vpow2.f32 %v2715_v15 }
0x1040   :  { %3360 = vpow2.f32 %v2711_v49 }
0x1048   :  { %v3357_v57 = vpop.eup %3356 }
0x1049   :  { %1989 = vrot.lane.b32.xlu1 %v3357_v57, %s3502_s24  ;;  %v3359_v32 = vpop.eup %3358 }
0x104a   :  { %v2147_v51 = vadd.f32 1.0, %v3359_v32  ;;  %v3361_v59 = vpop.eup %3360 }
0x104b   :  { %v1970_v36 = vadd.f32 1.0, %v3361_v59  ;;  %v2560_v59 = vld [vmem:[%s4160_s7 + $0x8] sm:$0xff] }
0x104c   :  { %3362 = vrcp.f32 %v2147_v51 }
0x104d   :  { %3364 = vrcp.f32 %v1970_v36  ;;  %v3503_v36 = vmov 0.0|0.0  }
0x1056   :  { %v3363_v62 = vpop.eup %3362 }
0x1057   :  { %v3365_v1 = vpop.eup %3364 }
0x10ad   :  { %v2167_v43 = vpop.permute.xlu0 %2166 }
0x10ae   :  { %v2169_v63 = vmul.f32 %v3363_v62, %v2167_v43  ;;  %v2562_v43 = vld [vmem:[%s4160_s7 + $0x18] sm:$0xff] }
0x10b0   :  { %2719 = vmatmul.mubr.msk.f32.vlgmr.msra.gmra.mrb[14].mxu0 %vm251_vm1, %v2169_v63 }
0x10b1   :  { %3111 = vmatpush1.bf16.msra.mxu0 %v3718_v60  ;;  %2414 = vmatprep.mubr.f32.mxu0 %v3501_v0 }
0x10b2   :  { %3113 = vmatprep.subr.bf16.mxu0 %v3720_v61 }
0x10b5   :  { %3115 = vmatpush1.bf16.msra.mxu0 %v3724_v3 }
0x10b6   :  { %3117 = vmatprep.subr.bf16.mxu0 %v3727_v4 }
0x10b9   :  { %3119 = vmatpush1.bf16.msra.mxu0 %v3730_v11 }
0x10ba   :  { %3121 = vmatprep.subr.bf16.mxu0 %v3733_v12 }
0x10bb   :  { %v1990_v2 = vpop.permute.xlu1 %1989 }
0x10bc   :  { %v1992_v5 = vmul.f32 %v3365_v1, %v1990_v2  ;;  %v2563_v1 = vld [vmem:[%s4160_s7 + $0x20] sm:$0xff]  ;;  %v2564_v2 = vld [vmem:[%s4160_s7 + $0x28] sm:$0xff] }
0x10bd   :  { %3123 = vmatpush1.bf16.msra.mxu0 %v3736_v20 }
0x10be   :  { %2713 = vmatmul.mubr.msk.f32.vlgmr.msra.gmra.mrb[10].mxu1 %vm251_vm1, %v1992_v5  ;;  %3125 = vmatprep.subr.bf16.mxu0 %v3739_v21  ;;  %v3147_v5 = vpack.c.bf16 %v2564_v2, %v2563_v1 }
0x10bf   :  { %3079 = vmatpush1.bf16.msra.mxu1 %v3742_v28  ;;  %2237 = vmatprep.mubr.f32.mxu1 %v3501_v0 }
0x10c0   :  { %3081 = vmatprep.subr.bf16.mxu1 %v3745_v29 }
0x10c3   :  { %3083 = vmatpush1.bf16.msra.mxu1 %v3749_v35 }
0x10c4   :  { %3085 = vmatprep.subr.bf16.mxu1 %v3753_v38 }
0x10c7   :  { %3087 = vmatpush1.bf16.msra.mxu1 %v3756_v47 }
0x10c8   :  { %3089 = vmatprep.subr.bf16.mxu1 %v3759_v48 }
0x10cb   :  { %3091 = vmatpush1.bf16.msra.mxu1 %v3762_v52 }
0x10cc   :  { %3140 = vmatprep.subr.bf16.mxu1 %v3503_v36 }
0x10ce   :  { %2716 = vmatmul.mubr.msk.f32.vlgmr.msra.gmra.mrb[10].mxu1 %vm251_vm1, %v2169_v63 }
0x10cf   :  { %2753 = vmatprep.mubr.msk.f32.mxu1 %vm3504_vm2, %v3501_v0 }
0x1183   :  { %v2342_v60 = vpop.f32.mrb[14].mxu0 }
0x1184   :  { %v2344_v61 = vpop.f32.mrb[15].mxu0  ;;  %v3166_v55 = vadd.f32 %v2342_v60, %v3709_v45  ;;  %v2565_v60 = vld [vmem:[%s4160_s7 + $0x30] sm:$0xff] }
0x1185   :  { %v3167_v3 = vadd.f32 %v2344_v61, %v3699_v39  ;;  %v2566_v61 = vld [vmem:[%s4160_s7 + $0x38] sm:$0xff] }
0x1186   :  { %v2721_v8 = vmul.f32 -1.442695, %v3166_v55 }
0x1187   :  { %3366 = vtanh.f32 %v3167_v3  ;;  %v2722_v33 = vmul.f32 -1.442695, %v3167_v3  ;;  %v3150_v3 = vpack.c.bf16 %v2566_v61, %v2565_v60 }
0x1191   :  { %v3367_v4 = vpop.eup %3366 }
0x1192   :  { %2438 = vrot.lane.b32.xlu0 %v3367_v4, %s3502_s24 }
0x11a1   :  { %v2239_v11 = vpop.f32.mrb[10].mxu1 }
0x11a2   :  { %v2241_v12 = vpop.f32.mrb[11].mxu1  ;;  %v2244_v39 = vadd.f32 %v2239_v11, %v3806_v37 }
0x11a3   :  { %v2245_v20 = vadd.f32 %v2241_v12, %v3798_v50 }
0x11a4   :  { %v2717_v16 = vmul.f32 -1.442695, %v2244_v39 }
0x11a5   :  { %3368 = vtanh.f32 %v2245_v20  ;;  %v2718_v42 = vmul.f32 -1.442695, %v2245_v20 }
0x11a6   :  { %3370 = vpow2.f32 %v2721_v8 }
0x11af   :  { %v3369_v21 = vpop.eup %3368 }
0x11b0   :  { %2261 = vrot.lane.b32.xlu1 %v3369_v21, %s3502_s24  ;;  %v3371_v9 = vpop.eup %3370 }
0x11b1   :  { %v2429_v14 = vadd.f32 1.0, %v3371_v9 }
0x11b3   :  { %3372 = vrcp.f32 %v2429_v14 }
0x11b4   :  { %3374 = vpow2.f32 %v2717_v16  ;;  %v2726_v16 = vld [vmem:[%s4161_s8] ss:$0 sm:$0xff] }
0x11bd   :  { %v3373_v19 = vpop.eup %3372 }
0x11be   :  { %v3375_v30 = vpop.eup %3374  ;;  %v2436_v58 = vmul.f32 %v3373_v19, %v4052_v40 }
0x11bf   :  { %v2252_v56 = vadd.f32 1.0, %v3375_v30 }
0x11c1   :  { %3376 = vrcp.f32 %v2252_v56 }
0x11cb   :  { %v3377_v10 = vpop.eup %3376 }
0x11cc   :  { %v2259_v53 = vmul.f32 %v3377_v10, %v4056_v46 }
0x1204   :  { %v2439_v25 = vpop.permute.xlu0 %2438 }
0x1205   :  { %v2441_v26 = vmul.f32 %v3373_v19, %v2439_v25 }
0x1207   :  { %2443 = vrot.lane.b32.xlu0 %v2441_v26, %s3502_s24 }
0x1222   :  { %v2262_v17 = vpop.permute.xlu1 %2261 }
0x1223   :  { %v2264_v45 = vmul.f32 %v3377_v10, %v2262_v17 }
0x1225   :  { %2266 = vrot.lane.b32.xlu1 %v2264_v45, %s3502_s24 }
0x1279   :  { %v2444_v13 = vpop.permute.xlu0 %2443 }
0x127a   :  { %v2446_v7 = vadd.f32 %v2444_v13, %v2436_v58 }
0x127c   :  { %3378 = vtanh.f32 %v2446_v7 }
0x1286   :  { %v3379_v18 = vpop.eup %3378 }
0x1287   :  { %2449 = vrot.lane.b32.xlu0 %v3379_v18, %s3502_s24 }
0x1297   :  { %v2267_v22 = vpop.permute.xlu1 %2266 }
0x1298   :  { %v4092_v27 = vadd.f32 %v2267_v22, %v2259_v53 }
0x129a   :  { %3380 = vtanh.f32 %v4092_v27 }
0x129b   :  { %3382 = vpow2.f32 %v2718_v42 }
0x129c   :  { %3384 = vpow2.f32 %v2722_v33 }
0x12a4   :  { %v3381_v23 = vpop.eup %3380 }
0x12a5   :  { %2272 = vrot.lane.b32.xlu1 %v3381_v23, %s3502_s24  ;;  %v3383_v31 = vpop.eup %3382 }
0x12a6   :  { %v2253_v34 = vadd.f32 1.0, %v3383_v31  ;;  %v3385_v41 = vpop.eup %3384 }
0x12a7   :  { %v2430_v44 = vadd.f32 1.0, %v3385_v41 }
0x12a8   :  { %3386 = vrcp.f32 %v2253_v34 }
0x12a9   :  { %3388 = vrcp.f32 %v2430_v44 }
0x12b2   :  { %v3387_v6 = vpop.eup %3386 }
0x12b3   :  { %v3389_v54 = vpop.eup %3388 }
0x12f9   :  { %v2450_v46 = vpop.permute.xlu0 %2449 }
0x12fa   :  { %v2452_v57 = vmul.f32 %v3389_v54, %v2450_v46 }
0x1317   :  { %v2273_v40 = vpop.permute.xlu1 %2272 }
0x1318   :  { %v2275_v24 = vmul.f32 %v3387_v6, %v2273_v40 }
0x131a   :  { %2720 = vmatmul.mubr.msk.f32.vlgmr.msra.gmra.mrb[18].mxu0 %vm251_vm1, %v2275_v24 }
0x131b   :  { %3127 = vmatpush1.bf16.msra.mxu0 %v3742_v28  ;;  %2520 = vmatprep.mubr.f32.mxu0 %v3501_v0 }
0x131c   :  { %3129 = vmatprep.subr.bf16.mxu0 %v3745_v29 }
0x131f   :  { %3131 = vmatpush1.bf16.msra.mxu0 %v3749_v35 }
0x1320   :  { %3133 = vmatprep.subr.bf16.mxu0 %v3753_v38 }
0x1323   :  { %3135 = vmatpush1.bf16.msra.mxu0 %v3756_v47 }
0x1324   :  { %3137 = vmatprep.subr.bf16.mxu0 %v3759_v48 }
0x1327   :  { %3139 = vmatpush1.bf16.msra.mxu0 %v3762_v52 }
0x132a   :  { %2723 = vmatmul.mubr.msk.f32.vlgmr.msra.gmra.mrb[18].mxu0 %vm251_vm1, %v2452_v57 }
0x13fd   :  { %v2522_v28 = vpop.f32.mrb[18].mxu0 }
0x13fe   :  { %v2524_v15 = vpop.f32.mrb[19].mxu0  ;;  %v2527_v35 = vadd.f32 %v2522_v28, %v3806_v37  ;;  %v2561_v37 = vld [vmem:[%s4160_s7 + $0x10] sm:$0xff] }
0x13ff   :  { %v2528_v29 = vadd.f32 %v2524_v15, %v3798_v50  ;;  %v2559_v50 = vld [vmem:[%s4160_s7] sm:$0xff]  ;;  %v3144_v63 = vpack.c.bf16 %v2562_v43, %v2561_v37 }
0x1400   :  { %v2724_v38 = vmul.f32 -1.442695, %v2527_v35  ;;  %v3141_v62 = vpack.c.bf16 %v2560_v59, %v2559_v50 }
0x1401   :  { %3390 = vtanh.f32 %v2528_v29  ;;  %v2725_v21 = vmul.f32 -1.442695, %v2528_v29 }
0x1402   :  { %3392 = vpow2.f32 %v2724_v38  ;;  %3142 = vmatpush3.bf16.msra.mxu1 %v3141_v62 }
0x1403   :  { %3143 = vmatprep.subr.bf16.mxu1 %v3503_v36 }
0x1406   :  { %3145 = vmatpush3.bf16.msra.mxu1 %v3144_v63 }
0x1407   :  { %3146 = vmatprep.subr.bf16.mxu1 %v3503_v36 }
0x140a   :  { %3148 = vmatpush3.bf16.msra.mxu1 %v3147_v5 }
0x140b   :  { %v3391_v49 = vpop.eup %3390  ;;  %3149 = vmatprep.subr.bf16.mxu1 %v3503_v36 }
0x140c   :  { %2544 = vrot.lane.b32.xlu1 %v3391_v49, %s3502_s24  ;;  %v3393_v47 = vpop.eup %3392 }
0x140d   :  { %v2535_v48 = vadd.f32 1.0, %v3393_v47 }
0x140e   :  { %3151 = vmatpush3.bf16.msra.mxu1 %v3150_v3 }
0x140f   :  { %3394 = vrcp.f32 %v2535_v48 }
0x1419   :  { %v3395_v32 = vpop.eup %3394 }
0x141a   :  { %v2542_v4 = vmul.f32 %v3395_v32, %v4092_v27 }
0x147e   :  { %v2545_v52 = vpop.permute.xlu1 %2544 }
0x147f   :  { %v2547_v51 = vmul.f32 %v3395_v32, %v2545_v52 }
0x1481   :  { %2549 = vrot.lane.b32.xlu0 %v2547_v51, %s3502_s24 }
0x14f3   :  { %v2550_v11 = vpop.permute.xlu0 %2549 }
0x14f4   :  { %v2552_v12 = vadd.f32 %v2550_v11, %v2542_v4 }
0x14f6   :  { %3396 = vtanh.f32 %v2552_v12 }
0x14f7   :  { %3398 = vpow2.f32 %v2725_v21 }
0x1500   :  { %v3397_v20 = vpop.eup %3396 }
0x1501   :  { %2555 = vrot.lane.b32.xlu1 %v3397_v20, %s3502_s24  ;;  %v3399_v55 = vpop.eup %3398 }
0x1502   :  { %v2536_v8 = vadd.f32 1.0, %v3399_v55 }
0x1504   :  { %3400 = vrcp.f32 %v2536_v8 }
0x150e   :  { %v3401_v9 = vpop.eup %3400 }
0x1573   :  { %v2556_v14 = vpop.permute.xlu1 %2555 }
0x1574   :  { %v2558_v39 = vmul.f32 %v3401_v9, %v2556_v14 }
0x1576   :  { %2754 = vmatmul.mubr.msk.f32.vlgmr.msra.gmra.mrb[12].mxu1 %vm251_vm1, %v2558_v39 }
0x1649   :  { %v2643_v0 = vpop.f32.mrb[12].mxu1 }
0x164a   :  { %v2644_v19 = vadd.f32 %v2726_v16, %v2643_v0  ;;  %v2755_v25 = vpop.f32.mrb[13].mxu1 }
0x164c   :  { %2647 = vst [vmem:[#allocation8] sm:$0xff] %v2644_v19 }
0x164d   :  { %3479 = shalt.err (!%p3476_p0)
}
0x164e   :  { %s3480_s20 = scalar_lea.hbm %s4162_s9, 128 }
0x164f   :  { %p3481_p1 = scmp.ne.s32.totalorder %s4162_s9, %s3480_s20  ;;  %p3484_p2 = scmp.lt.u32.totalorder %s3480_s20, %s4162_s9 }
0x1651   :  { %p3486_p3 = pnand %p3484_p2, %p3481_p1 }
0x1653   :  { %3489 = shalt.err (!%p3486_p3)
}
0x1654   :  { %2657 = dma.vmem_to_hbm [thread:$0]  %s2655_s16, 128, %s4162_s9, [#allocation4]  }
0x1655   :  { %3494 = dma.done.wait [#allocation4], 128  }
0x1656   :  { %3495 = vsyncadd [#allocation4], 4294967168 }
0x1657   :  { %2661 = vsyncpa [#allocation3], 1 }
0x1658   :  { %2662 = vsyncpa [#allocation6], 1 }
0x1659   :  { %2663 = vsyncpa [#allocation4], 1 }

</bundles_post_ra>
